<compile_context>
chip_gen: v6e
topology: v6e:2x2x1
jax: 0.10.0
libtpu: 0.0.40
codegen_flags: <defaults>
</compile_context>

<pallas_src>
import functools

import jax
import jax.numpy as jnp
from jax import lax
from jax.experimental import pallas as pl
from jax.experimental.pallas import tpu as pltpu


def _round_up(v, m):
    return (v + m - 1) // m * m


# PyTorch LSTM gate order is [i, f, g, o]; we pack as [i, f, o, g] so the three
# sigmoid gates form one contiguous (B, 3*HP) slab and tanh(g) is the last block.
_GATE_PERM = (0, 1, 3, 2)   # packed gate k  <-  PyTorch gate _GATE_PERM[k]

_NEG_BIG = -1e30            # "-inf" for padded logit lanes (safe under exp)


def _lstm_kernel(x_ref, wih_ref, whh_ref, b_ref, fcw_ref, fcb_ref,
                 w_out, h_out, c_out, gx_ref):
    """Whole-sequence LSTM forward, everything resident in VMEM (no grid).

    x_ref  : (T*B, IP)     bf16  time-major flattened, lane-padded input
    wih_ref: (IP, 4*HP)    bf16  W_ih^T, gate order [i,f,o,g], zero-padded
    whh_ref: (HP, 4*HP)    bf16  W_hh^T, gate order [i,f,o,g], zero-padded
    b_ref  : (1, 4*HP)     f32   bias_ih + bias_hh (zero in padded lanes)
    fcw_ref: (HP, 128)     f32   fc.weight^T (zero padded rows/columns)
    fcb_ref: (1, 128)      f32   fc.bias, padded lanes = -1e30
    w_out  : (B, 128)      f32   softmax(fc(h_T)); columns >= 3 are exactly 0
    h_out  : (B, HP)       f32   final hidden state (padded lanes stay 0)
    c_out  : (B, HP)       f32   final cell state   (padded lanes stay 0)
    gx_ref : (T, B, 4*HP)  f32   scratch: x·W_ih^T + b, precomputed for all t
    """
    T, B, _ = gx_ref.shape
    HP = h_out.shape[-1]

    # ---- hoisted input projection: one big MXU matmul, bias folded in ------
    gx = (jnp.dot(x_ref[...], wih_ref[...], preferred_element_type=jnp.float32)
          + b_ref[...])                                        # (T*B, 4*HP) f32
    for t in range(T):                                         # static scatter
        gx_ref[t] = gx[t * B:(t + 1) * B, :]

    whh = whh_ref[...]        # recurrent weight: load from VMEM once

    def step(t, carry):
        h, c = carry
        gates = gx_ref[t] + jnp.dot(h.astype(jnp.bfloat16), whh,
                                    preferred_element_type=jnp.float32)
        # one wide sigmoid over [i | f | o], one tanh over [g]
        sig = jax.nn.sigmoid(gates[:, :3 * HP])
        i_g = sig[:, 0 * HP:1 * HP]
        f_g = sig[:, 1 * HP:2 * HP]
        o_g = sig[:, 2 * HP:3 * HP]
        g_g = jnp.tanh(gates[:, 3 * HP:4 * HP])
        c_new = f_g * c + i_g * g_g
        h_new = o_g * jnp.tanh(c_new)
        return h_new, c_new

    h0 = jnp.zeros((B, HP), jnp.float32)
    c0 = jnp.zeros((B, HP), jnp.float32)
    h_f, c_f = lax.fori_loop(0, T, step, (h0, c0), unroll=True)

    # ---- fc + softmax epilogue (runs once; exact reciprocal) ---------------
    logits = (jnp.dot(h_f, fcw_ref[...], preferred_element_type=jnp.float32)
              + fcb_ref[...])                                  # (B, 128)
    m = jnp.max(logits, axis=-1, keepdims=True)
    e = jnp.exp(logits - m)                                    # padded lanes -> 0
    w_out[...] = e / jnp.sum(e, axis=-1, keepdims=True)
    h_out[...] = h_f
    c_out[...] = c_f


def pack_params(params):
    """One-time layout plumbing: pad / transpose / gate-reorder PyTorch weights.

    Keep this out of the per-call path — call it once when params are created.
    """
    f32 = jnp.float32
    I = params["weight_ih"].shape[1]
    H = params["weight_hh"].shape[1]
    IP = _round_up(I, 128)
    HP = _round_up(H, 128)

    wih_t = params["weight_ih"].T.astype(f32)                  # (I, 4H)
    whh_t = params["weight_hh"].T.astype(f32)                  # (H, 4H)
    bias = (params["bias_ih"] + params["bias_hh"]).astype(f32) # (4H,)

    wih_pad = jnp.zeros((IP, 4 * HP), f32)
    whh_pad = jnp.zeros((HP, 4 * HP), f32)
    b_pad = jnp.zeros((1, 4 * HP), f32)
    for k_new, k_pt in enumerate(_GATE_PERM):
        src = slice(k_pt * H, (k_pt + 1) * H)
        dst = slice(k_new * HP, k_new * HP + H)
        wih_pad = wih_pad.at[:I, dst].set(wih_t[:, src])
        whh_pad = whh_pad.at[:H, dst].set(whh_t[:, src])
        b_pad = b_pad.at[0, dst].set(bias[src])

    fcw_pad = (jnp.zeros((HP, 128), f32)
               .at[:H, :3].set(params["fc_weight"].T.astype(f32)))
    fcb_pad = (jnp.full((1, 128), _NEG_BIG, f32)
               .at[0, :3].set(params["fc_bias"].astype(f32)))

    return {
        "wih": wih_pad.astype(jnp.bfloat16),   # (IP, 4*HP)
        "whh": whh_pad.astype(jnp.bfloat16),   # (HP, 4*HP)
        "bias": b_pad,                          # (1, 4*HP)
        "fcw": fcw_pad,                         # (HP, 128)
        "fcb": fcb_pad,                         # (1, 128)
    }


@functools.partial(jax.jit, static_argnames=("hidden_size",))
def lstm_controller_forward(x, packed, *, hidden_size):
    """Forward pass of LSTMControllerModel.

    x: (B, T, I) float32 (batch_first, like the PyTorch module)
    packed: output of pack_params(params)
    returns: (weights (B,3), (h_n (1,B,H), c_n (1,B,H)))
    """
    B, T, I = x.shape
    IP = packed["wih"].shape[0]
    HP = packed["whh"].shape[0]
    H = hidden_size

    # Per-call input plumbing only: batch-major -> time-major, lane-pad, bf16,
    # flattened to (T*B, IP) so the kernel's one-shot projection needs no reshape.
    x_tbi = jnp.transpose(x, (1, 0, 2)).astype(jnp.float32)        # (T, B, I)
    x_pad = jnp.pad(x_tbi, ((0, 0), (0, 0), (0, IP - I)))          # (T, B, IP)
    x_flat = x_pad.reshape(T * B, IP).astype(jnp.bfloat16)         # (T*B, IP)

    w_pad, h_pad, c_pad = pl.pallas_call(
        _lstm_kernel,
        out_shape=(
            jax.ShapeDtypeStruct((B, 128), jnp.float32),
            jax.ShapeDtypeStruct((B, HP), jnp.float32),
            jax.ShapeDtypeStruct((B, HP), jnp.float32),
        ),
        scratch_shapes=[pltpu.VMEM((T, B, 4 * HP), jnp.float32)],
    )(x_flat, packed["wih"], packed["whh"], packed["bias"],
      packed["fcw"], packed["fcb"])

    weights = w_pad[:, :3]
    h_n = h_pad[:, :H][None, ...]     # match PyTorch hx shape (num_layers=1, B, H)
    c_n = c_pad[:, :H][None, ...]
    return weights, (h_n, c_n)


def _reference_forward(x, params):
    """Pure-JAX reference replicating torch.nn.LSTM (1 layer) + fc + softmax."""
    B, T, I = x.shape
    H = params["weight_hh"].shape[1]
    wih_t = params["weight_ih"].T
    whh_t = params["weight_hh"].T
    b = params["bias_ih"] + params["bias_hh"]
    h = jnp.zeros((B, H), jnp.float32)
    c = jnp.zeros((B, H), jnp.float32)
    for t in range(T):
        g = x[:, t] @ wih_t + h @ whh_t + b
        i_g = jax.nn.sigmoid(g[:, 0 * H:1 * H])
        f_g = jax.nn.sigmoid(g[:, 1 * H:2 * H])
        g_g = jnp.tanh(g[:, 2 * H:3 * H])
        o_g = jax.nn.sigmoid(g[:, 3 * H:4 * H])
        c = f_g * c + i_g * g_g
        h = o_g * jnp.tanh(c)
    logits = h @ params["fc_weight"].T + params["fc_bias"]
    w = jax.nn.softmax(logits, axis=-1)
    return w, (h[None], c[None])


def init_params(key, input_size=28, hidden_size=64):
    """Deterministic init mirroring PyTorch LSTM/Linear parameter shapes."""
    ks = jax.random.split(key, 6)
    H, I = hidden_size, input_size
    s = 1.0 / jnp.sqrt(H)
    u = lambda k, shape: jax.random.uniform(k, shape, jnp.float32, -s, s)
    return {
        "weight_ih": u(ks[0], (4 * H, I)),
        "weight_hh": u(ks[1], (4 * H, H)),
        "bias_ih": u(ks[2], (4 * H,)),
        "bias_hh": u(ks[3], (4 * H,)),
        "fc_weight": u(ks[4], (3, H)),
        "fc_bias": u(ks[5], (3,)),
    }


if __name__ == "__main__":
    B, T, I, H = 2, 8, 28, 64
    key = jax.random.PRNGKey(0)
    k_x, k_p = jax.random.split(key)
    x = jax.random.normal(k_x, (B, T, I), jnp.float32)
    params = init_params(k_p, input_size=I, hidden_size=H)

    packed = pack_params(params)   # one-time packing, outside the per-call path

    weights, (h_n, c_n) = lstm_controller_forward(x, packed, hidden_size=H)
    jax.block_until_ready((weights, h_n, c_n))

    # Sanity check against pure-JAX reference.
    w_ref, (h_ref, c_ref) = _reference_forward(x, params)
    assert weights.shape == (B, 3) and h_n.shape == (1, B, H) and c_n.shape == (1, B, H)
    assert jnp.allclose(weights, w_ref, atol=1e-2, rtol=1e-2)
    assert jnp.allclose(h_n, h_ref, atol=1e-2, rtol=1e-2)
    assert jnp.allclose(c_n, c_ref, atol=1e-2, rtol=1e-2)

    print("KERNEL_OK")
</pallas_src>

<mosaic_0001>
module attributes {stable_mosaic.version = 11 : i64} {
  func.func @_lstm_kernel(%arg0: memref<16x128xbf16, #tpu.memory_space<vmem>>, %arg1: memref<128x512xbf16, #tpu.memory_space<vmem>>, %arg2: memref<128x512xbf16, #tpu.memory_space<vmem>>, %arg3: memref<1x512xf32, #tpu.memory_space<vmem>>, %arg4: memref<128x128xf32, #tpu.memory_space<vmem>>, %arg5: memref<1x128xf32, #tpu.memory_space<vmem>>, %arg6: memref<2x128xf32, #tpu.memory_space<vmem>>, %arg7: memref<2x128xf32, #tpu.memory_space<vmem>>, %arg8: memref<2x128xf32, #tpu.memory_space<vmem>>, %arg9: memref<8x2x512xf32, #tpu.memory_space<vmem>>) attributes {dimension_semantics = [], scalar_prefetch = 0 : i64, scratch_operands = 1 : i64, tpu.core_type = #tpu.core_type<tc>} {
    %c0 = arith.constant 0 : index
    %c0_0 = arith.constant 0 : index
    %0 = vector.load %arg0[%c0, %c0_0] : memref<16x128xbf16, #tpu.memory_space<vmem>>, vector<16x128xbf16>
    %c0_1 = arith.constant 0 : index
    %c0_2 = arith.constant 0 : index
    %1 = vector.load %arg1[%c0_1, %c0_2] : memref<128x512xbf16, #tpu.memory_space<vmem>>, vector<128x512xbf16>
    %cst = arith.constant dense<0.000000e+00> : vector<16x512xf32>
    %2 = tpu.matmul %0, %1, %cst {dimension_numbers = #tpu.dot_dimension_numbers<[1], [0], [0], [1], [0, 0, 1, 1], [], []>} : vector<16x128xbf16>, vector<128x512xbf16>, vector<16x512xf32> -> vector<16x512xf32>
    %c0_3 = arith.constant 0 : index
    %c0_4 = arith.constant 0 : index
    %3 = vector.load %arg3[%c0_3, %c0_4] : memref<1x512xf32, #tpu.memory_space<vmem>>, vector<1x512xf32>
    %4 = vector.broadcast %3 : vector<1x512xf32> to vector<16x512xf32>
    %5 = arith.addf %2, %4 : vector<16x512xf32>
    %6 = vector.extract_strided_slice %5 {offsets = [0, 0], sizes = [2, 512], strides = [1, 1]} : vector<16x512xf32> to vector<2x512xf32>
    %c0_5 = arith.constant 0 : index
    %c0_6 = arith.constant 0 : index
    %c0_7 = arith.constant 0 : index
    %7 = vector.load %arg9[%c0_5, %c0_6, %c0_7] : memref<8x2x512xf32, #tpu.memory_space<vmem>>, vector<1x2x512xf32>
    %8 = vector.shape_cast %7 : vector<1x2x512xf32> to vector<2x512xf32>
    %9 = vector.shape_cast %6 : vector<2x512xf32> to vector<1x2x512xf32>
    tpu.vector_store %arg9[%c0_5, %c0_6, %c0_7], %9 {strides = array<i32>} : memref<8x2x512xf32, #tpu.memory_space<vmem>>, vector<1x2x512xf32>,
    %10 = vector.extract_strided_slice %5 {offsets = [2, 0], sizes = [2, 512], strides = [1, 1]} : vector<16x512xf32> to vector<2x512xf32>
    %c1 = arith.constant 1 : index
    %c0_8 = arith.constant 0 : index
    %c0_9 = arith.constant 0 : index
    %11 = vector.load %arg9[%c1, %c0_8, %c0_9] : memref<8x2x512xf32, #tpu.memory_space<vmem>>, vector<1x2x512xf32>
    %12 = vector.shape_cast %11 : vector<1x2x512xf32> to vector<2x512xf32>
    %13 = vector.shape_cast %10 : vector<2x512xf32> to vector<1x2x512xf32>
    tpu.vector_store %arg9[%c1, %c0_8, %c0_9], %13 {strides = array<i32>} : memref<8x2x512xf32, #tpu.memory_space<vmem>>, vector<1x2x512xf32>,
    %14 = vector.extract_strided_slice %5 {offsets = [4, 0], sizes = [2, 512], strides = [1, 1]} : vector<16x512xf32> to vector<2x512xf32>
    %c2 = arith.constant 2 : index
    %c0_10 = arith.constant 0 : index
    %c0_11 = arith.constant 0 : index
    %15 = vector.load %arg9[%c2, %c0_10, %c0_11] : memref<8x2x512xf32, #tpu.memory_space<vmem>>, vector<1x2x512xf32>
    %16 = vector.shape_cast %15 : vector<1x2x512xf32> to vector<2x512xf32>
    %17 = vector.shape_cast %14 : vector<2x512xf32> to vector<1x2x512xf32>
    tpu.vector_store %arg9[%c2, %c0_10, %c0_11], %17 {strides = array<i32>} : memref<8x2x512xf32, #tpu.memory_space<vmem>>, vector<1x2x512xf32>,
    %18 = vector.extract_strided_slice %5 {offsets = [6, 0], sizes = [2, 512], strides = [1, 1]} : vector<16x512xf32> to vector<2x512xf32>
    %c3 = arith.constant 3 : index
    %c0_12 = arith.constant 0 : index
    %c0_13 = arith.constant 0 : index
    %19 = vector.load %arg9[%c3, %c0_12, %c0_13] : memref<8x2x512xf32, #tpu.memory_space<vmem>>, vector<1x2x512xf32>
    %20 = vector.shape_cast %19 : vector<1x2x512xf32> to vector<2x512xf32>
    %21 = vector.shape_cast %18 : vector<2x512xf32> to vector<1x2x512xf32>
    tpu.vector_store %arg9[%c3, %c0_12, %c0_13], %21 {strides = array<i32>} : memref<8x2x512xf32, #tpu.memory_space<vmem>>, vector<1x2x512xf32>,
    %22 = vector.extract_strided_slice %5 {offsets = [8, 0], sizes = [2, 512], strides = [1, 1]} : vector<16x512xf32> to vector<2x512xf32>
    %c4 = arith.constant 4 : index
    %c0_14 = arith.constant 0 : index
    %c0_15 = arith.constant 0 : index
    %23 = vector.load %arg9[%c4, %c0_14, %c0_15] : memref<8x2x512xf32, #tpu.memory_space<vmem>>, vector<1x2x512xf32>
    %24 = vector.shape_cast %23 : vector<1x2x512xf32> to vector<2x512xf32>
    %25 = vector.shape_cast %22 : vector<2x512xf32> to vector<1x2x512xf32>
    tpu.vector_store %arg9[%c4, %c0_14, %c0_15], %25 {strides = array<i32>} : memref<8x2x512xf32, #tpu.memory_space<vmem>>, vector<1x2x512xf32>,
    %26 = vector.extract_strided_slice %5 {offsets = [10, 0], sizes = [2, 512], strides = [1, 1]} : vector<16x512xf32> to vector<2x512xf32>
    %c5 = arith.constant 5 : index
    %c0_16 = arith.constant 0 : index
    %c0_17 = arith.constant 0 : index
    %27 = vector.load %arg9[%c5, %c0_16, %c0_17] : memref<8x2x512xf32, #tpu.memory_space<vmem>>, vector<1x2x512xf32>
    %28 = vector.shape_cast %27 : vector<1x2x512xf32> to vector<2x512xf32>
    %29 = vector.shape_cast %26 : vector<2x512xf32> to vector<1x2x512xf32>
    tpu.vector_store %arg9[%c5, %c0_16, %c0_17], %29 {strides = array<i32>} : memref<8x2x512xf32, #tpu.memory_space<vmem>>, vector<1x2x512xf32>,
    %30 = vector.extract_strided_slice %5 {offsets = [12, 0], sizes = [2, 512], strides = [1, 1]} : vector<16x512xf32> to vector<2x512xf32>
    %c6 = arith.constant 6 : index
    %c0_18 = arith.constant 0 : index
    %c0_19 = arith.constant 0 : index
    %31 = vector.load %arg9[%c6, %c0_18, %c0_19] : memref<8x2x512xf32, #tpu.memory_space<vmem>>, vector<1x2x512xf32>
    %32 = vector.shape_cast %31 : vector<1x2x512xf32> to vector<2x512xf32>
    %33 = vector.shape_cast %30 : vector<2x512xf32> to vector<1x2x512xf32>
    tpu.vector_store %arg9[%c6, %c0_18, %c0_19], %33 {strides = array<i32>} : memref<8x2x512xf32, #tpu.memory_space<vmem>>, vector<1x2x512xf32>,
    %34 = vector.extract_strided_slice %5 {offsets = [14, 0], sizes = [2, 512], strides = [1, 1]} : vector<16x512xf32> to vector<2x512xf32>
    %c7 = arith.constant 7 : index
    %c0_20 = arith.constant 0 : index
    %c0_21 = arith.constant 0 : index
    %35 = vector.load %arg9[%c7, %c0_20, %c0_21] : memref<8x2x512xf32, #tpu.memory_space<vmem>>, vector<1x2x512xf32>
    %36 = vector.shape_cast %35 : vector<1x2x512xf32> to vector<2x512xf32>
    %37 = vector.shape_cast %34 : vector<2x512xf32> to vector<1x2x512xf32>
    tpu.vector_store %arg9[%c7, %c0_20, %c0_21], %37 {strides = array<i32>} : memref<8x2x512xf32, #tpu.memory_space<vmem>>, vector<1x2x512xf32>,
    %c0_22 = arith.constant 0 : index
    %c0_23 = arith.constant 0 : index
    %38 = vector.load %arg2[%c0_22, %c0_23] : memref<128x512xbf16, #tpu.memory_space<vmem>>, vector<128x512xbf16>
    %cst_24 = arith.constant 0.000000e+00 : f32
    %39 = vector.broadcast %cst_24 : f32 to vector<2x128xf32>
    %cst_25 = arith.constant 0.000000e+00 : f32
    %40 = vector.broadcast %cst_25 : f32 to vector<2x128xf32>
    %c0_i32 = arith.constant 0 : i32
    %41 = arith.index_cast %c0_i32 : i32 to index
    %c0_26 = arith.constant 0 : index
    %c0_27 = arith.constant 0 : index
    %42 = vector.load %arg9[%41, %c0_26, %c0_27] : memref<8x2x512xf32, #tpu.memory_space<vmem>>, vector<1x2x512xf32>
    %43 = vector.shape_cast %42 : vector<1x2x512xf32> to vector<2x512xf32>
    %44 = arith.truncf %39 : vector<2x128xf32> to vector<2x128xbf16>
    %cst_28 = arith.constant dense<0.000000e+00> : vector<2x512xf32>
    %45 = tpu.matmul %44, %38, %cst_28 {dimension_numbers = #tpu.dot_dimension_numbers<[1], [0], [0], [1], [0, 0, 1, 1], [], []>} : vector<2x128xbf16>, vector<128x512xbf16>, vector<2x512xf32> -> vector<2x512xf32>
    %46 = arith.addf %43, %45 : vector<2x512xf32>
    %47 = vector.extract_strided_slice %46 {offsets = [0, 0], sizes = [2, 384], strides = [1, 1]} : vector<2x512xf32> to vector<2x384xf32>
    %48 = arith.negf %47 : vector<2x384xf32>
    %49 = math.exp %48 : vector<2x384xf32>
    %cst_29 = arith.constant 1.000000e+00 : f32
    %50 = vector.broadcast %cst_29 : f32 to vector<2x384xf32>
    %51 = arith.addf %50, %49 : vector<2x384xf32>
    %52 = arith.divf %50, %51 : vector<2x384xf32>
    %53 = vector.extract_strided_slice %52 {offsets = [0, 0], sizes = [2, 128], strides = [1, 1]} : vector<2x384xf32> to vector<2x128xf32>
    %54 = vector.extract_strided_slice %52 {offsets = [0, 128], sizes = [2, 128], strides = [1, 1]} : vector<2x384xf32> to vector<2x128xf32>
    %55 = vector.extract_strided_slice %52 {offsets = [0, 256], sizes = [2, 128], strides = [1, 1]} : vector<2x384xf32> to vector<2x128xf32>
    %56 = vector.extract_strided_slice %46 {offsets = [0, 384], sizes = [2, 128], strides = [1, 1]} : vector<2x512xf32> to vector<2x128xf32>
    %57 = math.tanh %56 : vector<2x128xf32>
    %58 = arith.mulf %54, %40 : vector<2x128xf32>
    %59 = arith.mulf %53, %57 : vector<2x128xf32>
    %60 = arith.addf %58, %59 : vector<2x128xf32>
    %61 = math.tanh %60 : vector<2x128xf32>
    %62 = arith.mulf %55, %61 : vector<2x128xf32>
    %c1_i32 = arith.constant 1 : i32
    %63 = arith.index_cast %c1_i32 : i32 to index
    %c0_30 = arith.constant 0 : index
    %c0_31 = arith.constant 0 : index
    %64 = vector.load %arg9[%63, %c0_30, %c0_31] : memref<8x2x512xf32, #tpu.memory_space<vmem>>, vector<1x2x512xf32>
    %65 = vector.shape_cast %64 : vector<1x2x512xf32> to vector<2x512xf32>
    %66 = arith.truncf %62 : vector<2x128xf32> to vector<2x128xbf16>
    %cst_32 = arith.constant dense<0.000000e+00> : vector<2x512xf32>
    %67 = tpu.matmul %66, %38, %cst_32 {dimension_numbers = #tpu.dot_dimension_numbers<[1], [0], [0], [1], [0, 0, 1, 1], [], []>} : vector<2x128xbf16>, vector<128x512xbf16>, vector<2x512xf32> -> vector<2x512xf32>
    %68 = arith.addf %65, %67 : vector<2x512xf32>
    %69 = vector.extract_strided_slice %68 {offsets = [0, 0], sizes = [2, 384], strides = [1, 1]} : vector<2x512xf32> to vector<2x384xf32>
    %70 = arith.negf %69 : vector<2x384xf32>
    %71 = math.exp %70 : vector<2x384xf32>
    %cst_33 = arith.constant 1.000000e+00 : f32
    %72 = vector.broadcast %cst_33 : f32 to vector<2x384xf32>
    %73 = arith.addf %72, %71 : vector<2x384xf32>
    %74 = arith.divf %72, %73 : vector<2x384xf32>
    %75 = vector.extract_strided_slice %74 {offsets = [0, 0], sizes = [2, 128], strides = [1, 1]} : vector<2x384xf32> to vector<2x128xf32>
    %76 = vector.extract_strided_slice %74 {offsets = [0, 128], sizes = [2, 128], strides = [1, 1]} : vector<2x384xf32> to vector<2x128xf32>
    %77 = vector.extract_strided_slice %74 {offsets = [0, 256], sizes = [2, 128], strides = [1, 1]} : vector<2x384xf32> to vector<2x128xf32>
    %78 = vector.extract_strided_slice %68 {offsets = [0, 384], sizes = [2, 128], strides = [1, 1]} : vector<2x512xf32> to vector<2x128xf32>
    %79 = math.tanh %78 : vector<2x128xf32>
    %80 = arith.mulf %76, %60 : vector<2x128xf32>
    %81 = arith.mulf %75, %79 : vector<2x128xf32>
    %82 = arith.addf %80, %81 : vector<2x128xf32>
    %83 = math.tanh %82 : vector<2x128xf32>
    %84 = arith.mulf %77, %83 : vector<2x128xf32>
    %c2_i32 = arith.constant 2 : i32
    %85 = arith.index_cast %c2_i32 : i32 to index
    %c0_34 = arith.constant 0 : index
    %c0_35 = arith.constant 0 : index
    %86 = vector.load %arg9[%85, %c0_34, %c0_35] : memref<8x2x512xf32, #tpu.memory_space<vmem>>, vector<1x2x512xf32>
    %87 = vector.shape_cast %86 : vector<1x2x512xf32> to vector<2x512xf32>
    %88 = arith.truncf %84 : vector<2x128xf32> to vector<2x128xbf16>
    %cst_36 = arith.constant dense<0.000000e+00> : vector<2x512xf32>
    %89 = tpu.matmul %88, %38, %cst_36 {dimension_numbers = #tpu.dot_dimension_numbers<[1], [0], [0], [1], [0, 0, 1, 1], [], []>} : vector<2x128xbf16>, vector<128x512xbf16>, vector<2x512xf32> -> vector<2x512xf32>
    %90 = arith.addf %87, %89 : vector<2x512xf32>
    %91 = vector.extract_strided_slice %90 {offsets = [0, 0], sizes = [2, 384], strides = [1, 1]} : vector<2x512xf32> to vector<2x384xf32>
    %92 = arith.negf %91 : vector<2x384xf32>
    %93 = math.exp %92 : vector<2x384xf32>
    %cst_37 = arith.constant 1.000000e+00 : f32
    %94 = vector.broadcast %cst_37 : f32 to vector<2x384xf32>
    %95 = arith.addf %94, %93 : vector<2x384xf32>
    %96 = arith.divf %94, %95 : vector<2x384xf32>
    %97 = vector.extract_strided_slice %96 {offsets = [0, 0], sizes = [2, 128], strides = [1, 1]} : vector<2x384xf32> to vector<2x128xf32>
    %98 = vector.extract_strided_slice %96 {offsets = [0, 128], sizes = [2, 128], strides = [1, 1]} : vector<2x384xf32> to vector<2x128xf32>
    %99 = vector.extract_strided_slice %96 {offsets = [0, 256], sizes = [2, 128], strides = [1, 1]} : vector<2x384xf32> to vector<2x128xf32>
    %100 = vector.extract_strided_slice %90 {offsets = [0, 384], sizes = [2, 128], strides = [1, 1]} : vector<2x512xf32> to vector<2x128xf32>
    %101 = math.tanh %100 : vector<2x128xf32>
    %102 = arith.mulf %98, %82 : vector<2x128xf32>
    %103 = arith.mulf %97, %101 : vector<2x128xf32>
    %104 = arith.addf %102, %103 : vector<2x128xf32>
    %105 = math.tanh %104 : vector<2x128xf32>
    %106 = arith.mulf %99, %105 : vector<2x128xf32>
    %c3_i32 = arith.constant 3 : i32
    %107 = arith.index_cast %c3_i32 : i32 to index
    %c0_38 = arith.constant 0 : index
    %c0_39 = arith.constant 0 : index
    %108 = vector.load %arg9[%107, %c0_38, %c0_39] : memref<8x2x512xf32, #tpu.memory_space<vmem>>, vector<1x2x512xf32>
    %109 = vector.shape_cast %108 : vector<1x2x512xf32> to vector<2x512xf32>
    %110 = arith.truncf %106 : vector<2x128xf32> to vector<2x128xbf16>
    %cst_40 = arith.constant dense<0.000000e+00> : vector<2x512xf32>
    %111 = tpu.matmul %110, %38, %cst_40 {dimension_numbers = #tpu.dot_dimension_numbers<[1], [0], [0], [1], [0, 0, 1, 1], [], []>} : vector<2x128xbf16>, vector<128x512xbf16>, vector<2x512xf32> -> vector<2x512xf32>
    %112 = arith.addf %109, %111 : vector<2x512xf32>
    %113 = vector.extract_strided_slice %112 {offsets = [0, 0], sizes = [2, 384], strides = [1, 1]} : vector<2x512xf32> to vector<2x384xf32>
    %114 = arith.negf %113 : vector<2x384xf32>
    %115 = math.exp %114 : vector<2x384xf32>
    %cst_41 = arith.constant 1.000000e+00 : f32
    %116 = vector.broadcast %cst_41 : f32 to vector<2x384xf32>
    %117 = arith.addf %116, %115 : vector<2x384xf32>
    %118 = arith.divf %116, %117 : vector<2x384xf32>
    %119 = vector.extract_strided_slice %118 {offsets = [0, 0], sizes = [2, 128], strides = [1, 1]} : vector<2x384xf32> to vector<2x128xf32>
    %120 = vector.extract_strided_slice %118 {offsets = [0, 128], sizes = [2, 128], strides = [1, 1]} : vector<2x384xf32> to vector<2x128xf32>
    %121 = vector.extract_strided_slice %118 {offsets = [0, 256], sizes = [2, 128], strides = [1, 1]} : vector<2x384xf32> to vector<2x128xf32>
    %122 = vector.extract_strided_slice %112 {offsets = [0, 384], sizes = [2, 128], strides = [1, 1]} : vector<2x512xf32> to vector<2x128xf32>
    %123 = math.tanh %122 : vector<2x128xf32>
    %124 = arith.mulf %120, %104 : vector<2x128xf32>
    %125 = arith.mulf %119, %123 : vector<2x128xf32>
    %126 = arith.addf %124, %125 : vector<2x128xf32>
    %127 = math.tanh %126 : vector<2x128xf32>
    %128 = arith.mulf %121, %127 : vector<2x128xf32>
    %c4_i32 = arith.constant 4 : i32
    %129 = arith.index_cast %c4_i32 : i32 to index
    %c0_42 = arith.constant 0 : index
    %c0_43 = arith.constant 0 : index
    %130 = vector.load %arg9[%129, %c0_42, %c0_43] : memref<8x2x512xf32, #tpu.memory_space<vmem>>, vector<1x2x512xf32>
    %131 = vector.shape_cast %130 : vector<1x2x512xf32> to vector<2x512xf32>
    %132 = arith.truncf %128 : vector<2x128xf32> to vector<2x128xbf16>
    %cst_44 = arith.constant dense<0.000000e+00> : vector<2x512xf32>
    %133 = tpu.matmul %132, %38, %cst_44 {dimension_numbers = #tpu.dot_dimension_numbers<[1], [0], [0], [1], [0, 0, 1, 1], [], []>} : vector<2x128xbf16>, vector<128x512xbf16>, vector<2x512xf32> -> vector<2x512xf32>
    %134 = arith.addf %131, %133 : vector<2x512xf32>
    %135 = vector.extract_strided_slice %134 {offsets = [0, 0], sizes = [2, 384], strides = [1, 1]} : vector<2x512xf32> to vector<2x384xf32>
    %136 = arith.negf %135 : vector<2x384xf32>
    %137 = math.exp %136 : vector<2x384xf32>
    %cst_45 = arith.constant 1.000000e+00 : f32
    %138 = vector.broadcast %cst_45 : f32 to vector<2x384xf32>
    %139 = arith.addf %138, %137 : vector<2x384xf32>
    %140 = arith.divf %138, %139 : vector<2x384xf32>
    %141 = vector.extract_strided_slice %140 {offsets = [0, 0], sizes = [2, 128], strides = [1, 1]} : vector<2x384xf32> to vector<2x128xf32>
    %142 = vector.extract_strided_slice %140 {offsets = [0, 128], sizes = [2, 128], strides = [1, 1]} : vector<2x384xf32> to vector<2x128xf32>
    %143 = vector.extract_strided_slice %140 {offsets = [0, 256], sizes = [2, 128], strides = [1, 1]} : vector<2x384xf32> to vector<2x128xf32>
    %144 = vector.extract_strided_slice %134 {offsets = [0, 384], sizes = [2, 128], strides = [1, 1]} : vector<2x512xf32> to vector<2x128xf32>
    %145 = math.tanh %144 : vector<2x128xf32>
    %146 = arith.mulf %142, %126 : vector<2x128xf32>
    %147 = arith.mulf %141, %145 : vector<2x128xf32>
    %148 = arith.addf %146, %147 : vector<2x128xf32>
    %149 = math.tanh %148 : vector<2x128xf32>
    %150 = arith.mulf %143, %149 : vector<2x128xf32>
    %c5_i32 = arith.constant 5 : i32
    %151 = arith.index_cast %c5_i32 : i32 to index
    %c0_46 = arith.constant 0 : index
    %c0_47 = arith.constant 0 : index
    %152 = vector.load %arg9[%151, %c0_46, %c0_47] : memref<8x2x512xf32, #tpu.memory_space<vmem>>, vector<1x2x512xf32>
    %153 = vector.shape_cast %152 : vector<1x2x512xf32> to vector<2x512xf32>
    %154 = arith.truncf %150 : vector<2x128xf32> to vector<2x128xbf16>
    %cst_48 = arith.constant dense<0.000000e+00> : vector<2x512xf32>
    %155 = tpu.matmul %154, %38, %cst_48 {dimension_numbers = #tpu.dot_dimension_numbers<[1], [0], [0], [1], [0, 0, 1, 1], [], []>} : vector<2x128xbf16>, vector<128x512xbf16>, vector<2x512xf32> -> vector<2x512xf32>
    %156 = arith.addf %153, %155 : vector<2x512xf32>
    %157 = vector.extract_strided_slice %156 {offsets = [0, 0], sizes = [2, 384], strides = [1, 1]} : vector<2x512xf32> to vector<2x384xf32>
    %158 = arith.negf %157 : vector<2x384xf32>
    %159 = math.exp %158 : vector<2x384xf32>
    %cst_49 = arith.constant 1.000000e+00 : f32
    %160 = vector.broadcast %cst_49 : f32 to vector<2x384xf32>
    %161 = arith.addf %160, %159 : vector<2x384xf32>
    %162 = arith.divf %160, %161 : vector<2x384xf32>
    %163 = vector.extract_strided_slice %162 {offsets = [0, 0], sizes = [2, 128], strides = [1, 1]} : vector<2x384xf32> to vector<2x128xf32>
    %164 = vector.extract_strided_slice %162 {offsets = [0, 128], sizes = [2, 128], strides = [1, 1]} : vector<2x384xf32> to vector<2x128xf32>
    %165 = vector.extract_strided_slice %162 {offsets = [0, 256], sizes = [2, 128], strides = [1, 1]} : vector<2x384xf32> to vector<2x128xf32>
    %166 = vector.extract_strided_slice %156 {offsets = [0, 384], sizes = [2, 128], strides = [1, 1]} : vector<2x512xf32> to vector<2x128xf32>
    %167 = math.tanh %166 : vector<2x128xf32>
    %168 = arith.mulf %164, %148 : vector<2x128xf32>
    %169 = arith.mulf %163, %167 : vector<2x128xf32>
    %170 = arith.addf %168, %169 : vector<2x128xf32>
    %171 = math.tanh %170 : vector<2x128xf32>
    %172 = arith.mulf %165, %171 : vector<2x128xf32>
    %c6_i32 = arith.constant 6 : i32
    %173 = arith.index_cast %c6_i32 : i32 to index
    %c0_50 = arith.constant 0 : index
    %c0_51 = arith.constant 0 : index
    %174 = vector.load %arg9[%173, %c0_50, %c0_51] : memref<8x2x512xf32, #tpu.memory_space<vmem>>, vector<1x2x512xf32>
    %175 = vector.shape_cast %174 : vector<1x2x512xf32> to vector<2x512xf32>
    %176 = arith.truncf %172 : vector<2x128xf32> to vector<2x128xbf16>
    %cst_52 = arith.constant dense<0.000000e+00> : vector<2x512xf32>
    %177 = tpu.matmul %176, %38, %cst_52 {dimension_numbers = #tpu.dot_dimension_numbers<[1], [0], [0], [1], [0, 0, 1, 1], [], []>} : vector<2x128xbf16>, vector<128x512xbf16>, vector<2x512xf32> -> vector<2x512xf32>
    %178 = arith.addf %175, %177 : vector<2x512xf32>
    %179 = vector.extract_strided_slice %178 {offsets = [0, 0], sizes = [2, 384], strides = [1, 1]} : vector<2x512xf32> to vector<2x384xf32>
    %180 = arith.negf %179 : vector<2x384xf32>
    %181 = math.exp %180 : vector<2x384xf32>
    %cst_53 = arith.constant 1.000000e+00 : f32
    %182 = vector.broadcast %cst_53 : f32 to vector<2x384xf32>
    %183 = arith.addf %182, %181 : vector<2x384xf32>
    %184 = arith.divf %182, %183 : vector<2x384xf32>
    %185 = vector.extract_strided_slice %184 {offsets = [0, 0], sizes = [2, 128], strides = [1, 1]} : vector<2x384xf32> to vector<2x128xf32>
    %186 = vector.extract_strided_slice %184 {offsets = [0, 128], sizes = [2, 128], strides = [1, 1]} : vector<2x384xf32> to vector<2x128xf32>
    %187 = vector.extract_strided_slice %184 {offsets = [0, 256], sizes = [2, 128], strides = [1, 1]} : vector<2x384xf32> to vector<2x128xf32>
    %188 = vector.extract_strided_slice %178 {offsets = [0, 384], sizes = [2, 128], strides = [1, 1]} : vector<2x512xf32> to vector<2x128xf32>
    %189 = math.tanh %188 : vector<2x128xf32>
    %190 = arith.mulf %186, %170 : vector<2x128xf32>
    %191 = arith.mulf %185, %189 : vector<2x128xf32>
    %192 = arith.addf %190, %191 : vector<2x128xf32>
    %193 = math.tanh %192 : vector<2x128xf32>
    %194 = arith.mulf %187, %193 : vector<2x128xf32>
    %c7_i32 = arith.constant 7 : i32
    %195 = arith.index_cast %c7_i32 : i32 to index
    %c0_54 = arith.constant 0 : index
    %c0_55 = arith.constant 0 : index
    %196 = vector.load %arg9[%195, %c0_54, %c0_55] : memref<8x2x512xf32, #tpu.memory_space<vmem>>, vector<1x2x512xf32>
    %197 = vector.shape_cast %196 : vector<1x2x512xf32> to vector<2x512xf32>
    %198 = arith.truncf %194 : vector<2x128xf32> to vector<2x128xbf16>
    %cst_56 = arith.constant dense<0.000000e+00> : vector<2x512xf32>
    %199 = tpu.matmul %198, %38, %cst_56 {dimension_numbers = #tpu.dot_dimension_numbers<[1], [0], [0], [1], [0, 0, 1, 1], [], []>} : vector<2x128xbf16>, vector<128x512xbf16>, vector<2x512xf32> -> vector<2x512xf32>
    %200 = arith.addf %197, %199 : vector<2x512xf32>
    %201 = vector.extract_strided_slice %200 {offsets = [0, 0], sizes = [2, 384], strides = [1, 1]} : vector<2x512xf32> to vector<2x384xf32>
    %202 = arith.negf %201 : vector<2x384xf32>
    %203 = math.exp %202 : vector<2x384xf32>
    %cst_57 = arith.constant 1.000000e+00 : f32
    %204 = vector.broadcast %cst_57 : f32 to vector<2x384xf32>
    %205 = arith.addf %204, %203 : vector<2x384xf32>
    %206 = arith.divf %204, %205 : vector<2x384xf32>
    %207 = vector.extract_strided_slice %206 {offsets = [0, 0], sizes = [2, 128], strides = [1, 1]} : vector<2x384xf32> to vector<2x128xf32>
    %208 = vector.extract_strided_slice %206 {offsets = [0, 128], sizes = [2, 128], strides = [1, 1]} : vector<2x384xf32> to vector<2x128xf32>
    %209 = vector.extract_strided_slice %206 {offsets = [0, 256], sizes = [2, 128], strides = [1, 1]} : vector<2x384xf32> to vector<2x128xf32>
    %210 = vector.extract_strided_slice %200 {offsets = [0, 384], sizes = [2, 128], strides = [1, 1]} : vector<2x512xf32> to vector<2x128xf32>
    %211 = math.tanh %210 : vector<2x128xf32>
    %212 = arith.mulf %208, %192 : vector<2x128xf32>
    %213 = arith.mulf %207, %211 : vector<2x128xf32>
    %214 = arith.addf %212, %213 : vector<2x128xf32>
    %215 = math.tanh %214 : vector<2x128xf32>
    %216 = arith.mulf %209, %215 : vector<2x128xf32>
    %c8_i32 = arith.constant 8 : i32
    %c0_58 = arith.constant 0 : index
    %c0_59 = arith.constant 0 : index
    %217 = vector.load %arg4[%c0_58, %c0_59] : memref<128x128xf32, #tpu.memory_space<vmem>>, vector<128x128xf32>
    %cst_60 = arith.constant dense<0.000000e+00> : vector<2x128xf32>
    %218 = tpu.matmul %216, %217, %cst_60 {dimension_numbers = #tpu.dot_dimension_numbers<[1], [0], [0], [1], [0, 0, 1, 1], [], []>} : vector<2x128xf32>, vector<128x128xf32>, vector<2x128xf32> -> vector<2x128xf32>
    %c0_61 = arith.constant 0 : index
    %c0_62 = arith.constant 0 : index
    %219 = vector.load %arg5[%c0_61, %c0_62] : memref<1x128xf32, #tpu.memory_space<vmem>>, vector<1x128xf32>
    %220 = vector.broadcast %219 : vector<1x128xf32> to vector<2x128xf32>
    %221 = arith.addf %218, %220 : vector<2x128xf32>
    %cst_63 = arith.constant dense<0xFF800000> : vector<2xf32>
    %222 = vector.multi_reduction <maximumf>, %221, %cst_63 [1] : vector<2x128xf32> to vector<2xf32>
    %223 = vector.shape_cast %222 : vector<2xf32> to vector<2x1xf32>
    %224 = vector.broadcast %223 : vector<2x1xf32> to vector<2x128xf32>
    %225 = arith.subf %221, %224 : vector<2x128xf32>
    %226 = math.exp %225 : vector<2x128xf32>
    %cst_64 = arith.constant dense<0.000000e+00> : vector<2xf32>
    %227 = vector.multi_reduction <add>, %226, %cst_64 [1] : vector<2x128xf32> to vector<2xf32>
    %228 = vector.shape_cast %227 : vector<2xf32> to vector<2x1xf32>
    %229 = vector.broadcast %228 : vector<2x1xf32> to vector<2x128xf32>
    %230 = arith.divf %226, %229 : vector<2x128xf32>
    %c0_65 = arith.constant 0 : index
    %c0_66 = arith.constant 0 : index
    %231 = vector.load %arg6[%c0_65, %c0_66] : memref<2x128xf32, #tpu.memory_space<vmem>>, vector<2x128xf32>
    tpu.vector_store %arg6[%c0_65, %c0_66], %230 {strides = array<i32>} : memref<2x128xf32, #tpu.memory_space<vmem>>, vector<2x128xf32>,
    %c0_67 = arith.constant 0 : index
    %c0_68 = arith.constant 0 : index
    %232 = vector.load %arg7[%c0_67, %c0_68] : memref<2x128xf32, #tpu.memory_space<vmem>>, vector<2x128xf32>
    tpu.vector_store %arg7[%c0_67, %c0_68], %216 {strides = array<i32>} : memref<2x128xf32, #tpu.memory_space<vmem>>, vector<2x128xf32>,
    %c0_69 = arith.constant 0 : index
    %c0_70 = arith.constant 0 : index
    %233 = vector.load %arg8[%c0_69, %c0_70] : memref<2x128xf32, #tpu.memory_space<vmem>>, vector<2x128xf32>
    tpu.vector_store %arg8[%c0_69, %c0_70], %214 {strides = array<i32>} : memref<2x128xf32, #tpu.memory_space<vmem>>, vector<2x128xf32>,
    return
  }
}

</mosaic_0001>

<bundles_post_ra>
// kernel: lstm_controller_forward.1
= control target key start
LH: loop header
LB: loop body
LE: loop exit
PB: predicated region body
PF: predicated region fallthrough
CT: control target
= control target key end

     0   :  { %14 = vsyncpa [#allocation4], 0  ;;  %s2739_s0 = inlined_call_operand.vmem [shape: bf16[16,128], index: 0, kind: input, shape index: {}]   ;;  %s2740_s1 = inlined_call_operand.hbm [shape: bf16[128,512], index: 1, kind: input, shape index: {}]   ;;  %s2741_s2 = inlined_call_operand.hbm [shape: bf16[128,512], index: 2, kind: input, shape index: {}]   ;;  %s2742_s3 = inlined_call_operand.vmem [shape: f32[1,512], index: 3, kind: input, shape index: {}]   ;;  %s2743_s4 = inlined_call_operand.hbm [shape: f32[128,128], index: 4, kind: input, shape index: {}]   ;;  %s2744_s5 = inlined_call_operand.vmem [shape: f32[1,128], index: 5, kind: input, shape index: {}]   ;;  %s2745_s6 = inlined_call_operand.hbm [shape: f32[2,128], index: 6, kind: output, shape index: {0}]   ;;  %s2746_s7 = inlined_call_operand.vmem [shape: f32[2,128], index: 7, kind: output, shape index: {1}]   ;;  %s2747_s8 = inlined_call_operand.vmem [shape: f32[2,128], index: 8, kind: output, shape index: {2}]  }
   0x1   :  { %15 = vsyncpa [#allocation7], 0 }
   0x2   :  { %16 = vsyncpa [#allocation5], 0  ;;  %s2230_s27 = smov [#allocation6]   ;;  %s2231_s29 = smov [#allocation3]  }
   0x3   :  { %s36_s28 = sshll.u32 %s2230_s27, 4  ;;  %s24_s30 = sshll.u32 %s2231_s29, 4  ;;  %s37_s28 = int_to_ptr.vmem [resolvable:$true] %s36_s28  ;;  %s25_s30 = int_to_ptr.vmem [resolvable:$true] %s24_s30 }
   0x4   :  { %s2152_s9 = scalar_lea.vmem %s37_s28, 4096  ;;  %p2157_p1 = scmp.lt.s32.totalorder %s37_s28, %s37_s28 }
   0x5   :  { %p2153_p0 = scmp.ne.s32.totalorder %s37_s28, %s2152_s9  ;;  %p2158_p2 = scmp.lt.s32.totalorder %s2152_s9, %s2152_s9 }
   0x7   :  { %p2159_p3 = por %p2158_p2, %p2157_p1 }
   0x9   :  { %p2160_p4 = pnand %p2159_p3, %p2153_p0 }
   0xb   :  { %2163 = shalt.err (!%p2160_p4)
}
   0xc   :  { %s2232_s10 = smov 256   ;;  %s2233_s11 = smov 16  }
   0xd   :  { %42 = dma.hbm_to_vmem [thread:$0]  %s2741_s2, 4096, %s37_s28, [#allocation7], %s2232_s10, %s2232_s10, %s2233_s11  }
   0xe   :  { %s2172_s14 = scalar_lea.vmem %s25_s30, 4096  ;;  %p2177_p6 = scmp.lt.s32.totalorder %s25_s30, %s25_s30 }
   0xf   :  { %p2173_p5 = scmp.ne.s32.totalorder %s25_s30, %s2172_s14  ;;  %p2178_p7 = scmp.lt.s32.totalorder %s2172_s14, %s2172_s14 }
  0x11   :  { %p2179_p8 = por %p2178_p7, %p2177_p6 }
  0x13   :  { %p2180_p9 = pnand %p2179_p8, %p2173_p5 }
  0x15   :  { %2183 = shalt.err (!%p2180_p9)
}
  0x16   :  { %30 = dma.hbm_to_vmem [thread:$0]  %s2740_s1, 4096, %s25_s30, [#allocation4], %s2232_s10, %s2232_s10, %s2233_s11  }
  0x17   :  { %s2234_s17 = smov [#allocation8]  }
  0x18   :  { %s50_s18 = sshll.u32 %s2234_s17, 4  ;;  %s51_s18 = int_to_ptr.vmem [resolvable:$true] %s50_s18 }
  0x19   :  { %s2192_s19 = scalar_lea.vmem %s51_s18, 2048  ;;  %p2197_p11 = scmp.lt.s32.totalorder %s51_s18, %s51_s18 }
  0x1a   :  { %p2193_p10 = scmp.ne.s32.totalorder %s51_s18, %s2192_s19  ;;  %p2198_p12 = scmp.lt.s32.totalorder %s2192_s19, %s2192_s19 }
  0x1c   :  { %p2199_p13 = por %p2198_p12, %p2197_p11 }
  0x1e   :  { %p2200_p0 = pnand %p2199_p13, %p2193_p10 }
  0x20   :  { %2203 = shalt.err (!%p2200_p0)
}
  0x21   :  { %s2235_s2 = smov 128   ;;  %s2236_s20 = smov 8  }
  0x22   :  { %56 = dma.hbm_to_vmem [thread:$0]  %s2743_s4, 2048, %s51_s18, [#allocation7], %s2235_s2, %s2235_s2, %s2236_s20  }
  0x23   :  { %2224 = dma.done.wait [#allocation4], 4096  }
  0x24   :  { %2225 = vsyncadd [#allocation4], 4294963200 }
  0x25   :  { %2226 = dma.done.wait [#allocation7], 6144  }
  0x26   :  { %2227 = vsyncadd [#allocation7], 4294961152  ;;  %v2237_v0 = vmov 0   ;;  %v1957_v1 = vld [vmem:[#allocation3 + $0xe4] ss:$16 sps:$4 sm:$0xff]   ;;  %vm2240_vm0 = vmmov 0  }
  0x27   :  { %323 = vmatprep.mubr.bf16.mxu0 %v2237_v0  ;;  %366 = vmatprep.mubr.bf16.mxu1 %v2237_v0  ;;  %v1959_v2 = vld [vmem:[#allocation3 + $0xec] ss:$16 sps:$4 sm:$0xff]   ;;  %v1961_v3 = vld [vmem:[#allocation3 + $0xe0] ss:$16 sps:$4 sm:$0xff]   ;;  %v1962_v4 = vld [vmem:[#allocation3 + $0xe8] ss:$16 sps:$4 sm:$0xff]  }
  0x28   :  { %291 = vmatprep.subr.bf16.mxu0 %v1957_v1  ;;  %334 = vmatprep.subr.bf16.mxu1 %v1959_v2  ;;  %v1963_v5 = vld [vmem:[#allocation3 + $0xc4] ss:$16 sps:$4 sm:$0xff]   ;;  %v1965_v6 = vld [vmem:[#allocation3 + $0xcc] ss:$16 sps:$4 sm:$0xff]   ;;  %v1967_v7 = vld [vmem:[#allocation3 + $0xc0] ss:$16 sps:$4 sm:$0xff]  }
  0x29   :  { %292 = vmatpush1.bf16.msra.mxu0 %v1961_v3  ;;  %335 = vmatpush1.bf16.msra.mxu1 %v1962_v4  ;;  %v1968_v8 = vld [vmem:[#allocation3 + $0xc8] ss:$16 sps:$4 sm:$0xff]   ;;  %v1969_v9 = vld [vmem:[#allocation3 + $0xa4] ss:$16 sps:$4 sm:$0xff]   ;;  %v1971_v10 = vld [vmem:[#allocation3 + $0xac] ss:$16 sps:$4 sm:$0xff]   ;;  %v105_v3 = vlaneseq }
  0x2a   :  { %293 = vmatprep.subr.bf16.mxu0 %v1963_v5  ;;  %336 = vmatprep.subr.bf16.mxu1 %v1965_v6  ;;  %v1973_v11 = vld [vmem:[#allocation3 + $0xa0] ss:$16 sps:$4 sm:$0xff]   ;;  %v1974_v12 = vld [vmem:[#allocation3 + $0xa8] ss:$16 sps:$4 sm:$0xff]   ;;  %v1975_v13 = vld [vmem:[#allocation3 + $0x84] ss:$16 sps:$4 sm:$0xff]  }
  0x2b   :  { %v1977_v14 = vld [vmem:[#allocation3 + $0x8c] ss:$16 sps:$4 sm:$0xff]   ;;  %v1979_v15 = vld [vmem:[#allocation3 + $0x80] ss:$16 sps:$4 sm:$0xff]   ;;  %v1980_v16 = vld [vmem:[#allocation3 + $0x88] ss:$16 sps:$4 sm:$0xff]  }
  0x2c   :  { %v1981_v17 = vld [vmem:[#allocation3 + $0x64] ss:$16 sps:$4 sm:$0xff]   ;;  %v1983_v18 = vld [vmem:[#allocation3 + $0x6c] ss:$16 sps:$4 sm:$0xff]   ;;  %v1985_v19 = vld [vmem:[#allocation3 + $0x60] ss:$16 sps:$4 sm:$0xff]  }
  0x2d   :  { %294 = vmatpush1.bf16.msra.mxu0 %v1967_v7  ;;  %337 = vmatpush1.bf16.msra.mxu1 %v1968_v8  ;;  %v1986_v20 = vld [vmem:[#allocation3 + $0x68] ss:$16 sps:$4 sm:$0xff]   ;;  %v1987_v21 = vld [vmem:[#allocation3 + $0x44] ss:$16 sps:$4 sm:$0xff]   ;;  %v1989_v22 = vld [vmem:[#allocation3 + $0x4c] ss:$16 sps:$4 sm:$0xff]  }
  0x2e   :  { %295 = vmatprep.subr.bf16.mxu0 %v1969_v9  ;;  %338 = vmatprep.subr.bf16.mxu1 %v1971_v10  ;;  %v1991_v23 = vld [vmem:[#allocation3 + $0x40] ss:$16 sps:$4 sm:$0xff]   ;;  %v1992_v24 = vld [vmem:[#allocation3 + $0x48] ss:$16 sps:$4 sm:$0xff]   ;;  %v1993_v25 = vld [vmem:[#allocation3 + $0x24] ss:$16 sps:$4 sm:$0xff]  }
  0x2f   :  { %v1995_v26 = vld [vmem:[#allocation3 + $0x2c] ss:$16 sps:$4 sm:$0xff]   ;;  %v1997_v27 = vld [vmem:[#allocation3 + $0x20] ss:$16 sps:$4 sm:$0xff]   ;;  %v1998_v28 = vld [vmem:[#allocation3 + $0x28] ss:$16 sps:$4 sm:$0xff]  }
  0x30   :  { %v1999_v29 = vld [vmem:[#allocation3 + $0x4] ss:$16 sps:$4 sm:$0xff]   ;;  %v2001_v30 = vld [vmem:[#allocation3 + $0xc] ss:$16 sps:$4 sm:$0xff]   ;;  %v2003_v31 = vld [vmem:[#allocation3] ss:$16 sps:$4 sm:$0xff]  }
  0x31   :  { %296 = vmatpush1.bf16.msra.mxu0 %v1973_v11  ;;  %339 = vmatpush1.bf16.msra.mxu1 %v1974_v12  ;;  %v2004_v32 = vld [vmem:[#allocation3 + $0x8] ss:$16 sps:$4 sm:$0xff]   ;;  %v2298_v33 = vld [vmem:[#allocation6 + $0xe4] ss:$16 sps:$4 sm:$0xff]   ;;  %v2300_v34 = vld [vmem:[#allocation6 + $0xec] ss:$16 sps:$4 sm:$0xff]  }
  0x32   :  { %297 = vmatprep.subr.bf16.mxu0 %v1975_v13  ;;  %340 = vmatprep.subr.bf16.mxu1 %v1977_v14  ;;  %v2005_v35 = vld [vmem:[%s2739_s0] sm:$0xff]   ;;  %v2307_v37 = vld [vmem:[#allocation6 + $0xe8] ss:$16 sps:$4 sm:$0xff]   ;;  %v2313_v39 = vld [vmem:[#allocation6 + $0xcc] ss:$16 sps:$4 sm:$0xff]   ;;  %v106_v4 = vshrl.u32 %v105_v3, 7 }
  0x33   :  { %v2305_v36 = vld [vmem:[#allocation6 + $0xe0] ss:$16 sps:$4 sm:$0xff]   ;;  %v2309_v38 = vld [vmem:[#allocation6 + $0xc4] ss:$16 sps:$4 sm:$0xff]   ;;  %v2319_v41 = vld [vmem:[#allocation6 + $0xc8] ss:$16 sps:$4 sm:$0xff]  }
  0x34   :  { %v2315_v40 = vld [vmem:[#allocation6 + $0xc0] ss:$16 sps:$4 sm:$0xff]   ;;  %v2323_v42 = vld [vmem:[#allocation6 + $0xa4] ss:$16 sps:$4 sm:$0xff]   ;;  %v2325_v43 = vld [vmem:[#allocation6 + $0xac] ss:$16 sps:$4 sm:$0xff]  }
  0x35   :  { %298 = vmatpush1.bf16.msra.mxu0 %v1979_v15  ;;  %341 = vmatpush1.bf16.msra.mxu1 %v1980_v16  ;;  %v2331_v44 = vld [vmem:[#allocation6 + $0xa0] ss:$16 sps:$4 sm:$0xff]   ;;  %v2333_v45 = vld [vmem:[#allocation6 + $0xa8] ss:$16 sps:$4 sm:$0xff]   ;;  %v2335_v46 = vld [vmem:[#allocation6 + $0x84] ss:$16 sps:$4 sm:$0xff]  }
  0x36   :  { %299 = vmatprep.subr.bf16.mxu0 %v1981_v17  ;;  %342 = vmatprep.subr.bf16.mxu1 %v1983_v18  ;;  %v2339_v47 = vld [vmem:[#allocation6 + $0x8c] ss:$16 sps:$4 sm:$0xff]   ;;  %v2343_v48 = vld [vmem:[#allocation6 + $0x80] ss:$16 sps:$4 sm:$0xff]   ;;  %v2345_v49 = vld [vmem:[#allocation6 + $0x88] ss:$16 sps:$4 sm:$0xff]  }
  0x37   :  { %v2349_v50 = vld [vmem:[#allocation6 + $0x64] ss:$16 sps:$4 sm:$0xff]   ;;  %v2351_v51 = vld [vmem:[#allocation6 + $0x6c] ss:$16 sps:$4 sm:$0xff]   ;;  %v2355_v52 = vld [vmem:[#allocation6 + $0x60] ss:$16 sps:$4 sm:$0xff]  }
  0x38   :  { %v2357_v53 = vld [vmem:[#allocation6 + $0x68] ss:$16 sps:$4 sm:$0xff]   ;;  %v2361_v54 = vld [vmem:[#allocation6 + $0x44] ss:$16 sps:$4 sm:$0xff]   ;;  %v2363_v55 = vld [vmem:[#allocation6 + $0x4c] ss:$16 sps:$4 sm:$0xff]  }
  0x39   :  { %300 = vmatpush1.bf16.msra.mxu0 %v1985_v19  ;;  %343 = vmatpush1.bf16.msra.mxu1 %v1986_v20  ;;  %v2367_v56 = vld [vmem:[#allocation6 + $0x40] ss:$16 sps:$4 sm:$0xff]   ;;  %v2369_v57 = vld [vmem:[#allocation6 + $0x48] ss:$16 sps:$4 sm:$0xff]   ;;  %v2373_v58 = vld [vmem:[#allocation6 + $0x24] ss:$16 sps:$4 sm:$0xff]  }
  0x3a   :  { %301 = vmatprep.subr.bf16.mxu0 %v1987_v21  ;;  %344 = vmatprep.subr.bf16.mxu1 %v1989_v22  ;;  %v2375_v59 = vld [vmem:[#allocation6 + $0x2c] ss:$16 sps:$4 sm:$0xff]   ;;  %v2379_v60 = vld [vmem:[#allocation6 + $0x20] ss:$16 sps:$4 sm:$0xff]   ;;  %v2381_v61 = vld [vmem:[#allocation6 + $0x28] ss:$16 sps:$4 sm:$0xff]  }
  0x3b   :  { %v2385_v62 = vld [vmem:[#allocation6 + $0x4] ss:$16 sps:$4 sm:$0xff]   ;;  %v2387_v63 = vld [vmem:[#allocation6 + $0xc] ss:$16 sps:$4 sm:$0xff]   ;;  %v2391_v1 = vld [vmem:[#allocation6] ss:$16 sps:$4 sm:$0xff]  }
  0x3c   :  { %v2393_v2 = vld [vmem:[#allocation6 + $0x8] ss:$16 sps:$4 sm:$0xff]   ;;  %v107_v5 = vsub.s32 0, %v106_v4  ;;  %v115_v6 = vsub.s32 2, %v106_v4  ;;  %v103_v7 = vld [vmem:[%s2742_s3] sm:$0xf] }
  0x3d   :  { %302 = vmatpush1.bf16.msra.mxu0 %v1991_v23  ;;  %345 = vmatpush1.bf16.msra.mxu1 %v1992_v24  ;;  %v2238_v8 = vmov 1983009808   ;;  %v111_v10 = vsub.s32 1, %v106_v4  ;;  %v119_v11 = vsub.s32 3, %v106_v4  ;;  %vm1780_vm1 = vcmask 1041408  }
  0x3e   :  { %303 = vmatprep.subr.bf16.mxu0 %v1993_v25  ;;  %346 = vmatprep.subr.bf16.mxu1 %v1995_v26  ;;  %v384_v9 = vunpack.c.l.s4 %v2238_v8  ;;  %v108_v12 = vrot.slane %v103_v7, %v107_v5  ;;  %v116_v13 = vrot.slane %v103_v7, %v115_v6 }
  0x3f   :  { %v112_v15 = vrot.slane %v103_v7, %v111_v10  ;;  %v120_v16 = vrot.slane %v103_v7, %v119_v11 }
  0x40   :  { %v385_v14 = vunpack.c.0.s8 %v384_v9 }
  0x41   :  { %304 = vmatpush1.bf16.msra.mxu0 %v1997_v27  ;;  %347 = vmatpush1.bf16.msra.mxu1 %v1998_v28 }
  0x42   :  { %305 = vmatprep.subr.bf16.mxu0 %v1999_v29  ;;  %348 = vmatprep.subr.bf16.mxu1 %v2001_v30  ;;  %v2440_v23 = vsub.s32 %v385_v14, %v106_v4 }
  0x45   :  { %306 = vmatpush1.bf16.msra.mxu0 %v2003_v31  ;;  %349 = vmatpush1.bf16.msra.mxu1 %v2004_v32 }
  0x46   :  { %673 = vmatprep.subr.bf16.mxu0 %v2298_v33  ;;  %714 = vmatprep.subr.bf16.mxu1 %v2300_v34 }
  0x48   :  { %324 = vmatmul.mubr.bf16.vlgmr.msra.gmra.mxu0 %v2005_v35  ;;  %367 = vmatmul.mubr.bf16.vlgmr.msra.gmra.mxu1 %v2005_v35 }
  0x49   :  { %674 = vmatpush1.bf16.msra.mxu0 %v2305_v36  ;;  %715 = vmatpush1.bf16.msra.mxu1 %v2307_v37 }
  0x4a   :  { %675 = vmatprep.subr.bf16.mxu0 %v2309_v38  ;;  %716 = vmatprep.subr.bf16.mxu1 %v2313_v39 }
  0x4b   :  { %705 = vmatprep.mubr.bf16.mxu0 %v2237_v0  ;;  %746 = vmatprep.mubr.bf16.mxu1 %v2237_v0 }
  0x4d   :  { %676 = vmatpush1.bf16.msra.mxu0 %v2315_v40  ;;  %717 = vmatpush1.bf16.msra.mxu1 %v2319_v41 }
  0x4e   :  { %677 = vmatprep.subr.bf16.mxu0 %v2323_v42  ;;  %718 = vmatprep.subr.bf16.mxu1 %v2325_v43 }
  0x51   :  { %678 = vmatpush1.bf16.msra.mxu0 %v2331_v44  ;;  %719 = vmatpush1.bf16.msra.mxu1 %v2333_v45 }
  0x52   :  { %679 = vmatprep.subr.bf16.mxu0 %v2335_v46  ;;  %720 = vmatprep.subr.bf16.mxu1 %v2339_v47 }
  0x55   :  { %680 = vmatpush1.bf16.msra.mxu0 %v2343_v48  ;;  %721 = vmatpush1.bf16.msra.mxu1 %v2345_v49 }
  0x56   :  { %681 = vmatprep.subr.bf16.mxu0 %v2349_v50  ;;  %722 = vmatprep.subr.bf16.mxu1 %v2351_v51 }
  0x59   :  { %682 = vmatpush1.bf16.msra.mxu0 %v2355_v52  ;;  %723 = vmatpush1.bf16.msra.mxu1 %v2357_v53 }
  0x5a   :  { %683 = vmatprep.subr.bf16.mxu0 %v2361_v54  ;;  %724 = vmatprep.subr.bf16.mxu1 %v2363_v55 }
  0x5d   :  { %684 = vmatpush1.bf16.msra.mxu0 %v2367_v56  ;;  %725 = vmatpush1.bf16.msra.mxu1 %v2369_v57 }
  0x5e   :  { %685 = vmatprep.subr.bf16.mxu0 %v2373_v58  ;;  %726 = vmatprep.subr.bf16.mxu1 %v2375_v59 }
  0x61   :  { %686 = vmatpush1.bf16.msra.mxu0 %v2379_v60  ;;  %727 = vmatpush1.bf16.msra.mxu1 %v2381_v61 }
  0x62   :  { %687 = vmatprep.subr.bf16.mxu0 %v2385_v62  ;;  %728 = vmatprep.subr.bf16.mxu1 %v2387_v63 }
  0x65   :  { %688 = vmatpush1.bf16.msra.mxu0 %v2391_v1  ;;  %729 = vmatpush1.bf16.msra.mxu1 %v2393_v2 }
  0x66   :  { %800 = vmatprep.subr.bf16.mxu0 %v2298_v33  ;;  %841 = vmatprep.subr.bf16.mxu1 %v2300_v34 }
  0x68   :  { %706 = vmatmul.mubr.bf16.vlgmr.msra.gmra.mxu0 %v2237_v0  ;;  %747 = vmatmul.mubr.bf16.vlgmr.msra.gmra.mxu1 %v2237_v0 }
  0x69   :  { %801 = vmatpush1.bf16.msra.mxu0 %v2305_v36  ;;  %842 = vmatpush1.bf16.msra.mxu1 %v2307_v37 }
  0x6a   :  { %802 = vmatprep.subr.bf16.mxu0 %v2309_v38  ;;  %843 = vmatprep.subr.bf16.mxu1 %v2313_v39 }
  0x6b   :  { %832 = vmatprep.mubr.bf16.mxu0 %v2237_v0  ;;  %873 = vmatprep.mubr.bf16.mxu1 %v2237_v0 }
  0x6d   :  { %803 = vmatpush1.bf16.msra.mxu0 %v2315_v40  ;;  %844 = vmatpush1.bf16.msra.mxu1 %v2319_v41 }
  0x6e   :  { %804 = vmatprep.subr.bf16.mxu0 %v2323_v42  ;;  %845 = vmatprep.subr.bf16.mxu1 %v2325_v43 }
  0x71   :  { %805 = vmatpush1.bf16.msra.mxu0 %v2331_v44  ;;  %846 = vmatpush1.bf16.msra.mxu1 %v2333_v45 }
  0x72   :  { %806 = vmatprep.subr.bf16.mxu0 %v2335_v46  ;;  %847 = vmatprep.subr.bf16.mxu1 %v2339_v47 }
  0x75   :  { %807 = vmatpush1.bf16.msra.mxu0 %v2343_v48  ;;  %848 = vmatpush1.bf16.msra.mxu1 %v2345_v49 }
  0x76   :  { %808 = vmatprep.subr.bf16.mxu0 %v2349_v50  ;;  %849 = vmatprep.subr.bf16.mxu1 %v2351_v51 }
  0x79   :  { %809 = vmatpush1.bf16.msra.mxu0 %v2355_v52  ;;  %850 = vmatpush1.bf16.msra.mxu1 %v2357_v53 }
  0x7a   :  { %810 = vmatprep.subr.bf16.mxu0 %v2361_v54  ;;  %851 = vmatprep.subr.bf16.mxu1 %v2363_v55 }
  0x7d   :  { %811 = vmatpush1.bf16.msra.mxu0 %v2367_v56  ;;  %852 = vmatpush1.bf16.msra.mxu1 %v2369_v57 }
  0x7e   :  { %812 = vmatprep.subr.bf16.mxu0 %v2373_v58  ;;  %853 = vmatprep.subr.bf16.mxu1 %v2375_v59 }
  0x81   :  { %813 = vmatpush1.bf16.msra.mxu0 %v2379_v60  ;;  %854 = vmatpush1.bf16.msra.mxu1 %v2381_v61 }
  0x82   :  { %814 = vmatprep.subr.bf16.mxu0 %v2385_v62  ;;  %855 = vmatprep.subr.bf16.mxu1 %v2387_v63 }
  0x85   :  { %815 = vmatpush1.bf16.msra.mxu0 %v2391_v1  ;;  %856 = vmatpush1.bf16.msra.mxu1 %v2393_v2 }
  0x86   :  { %927 = vmatprep.subr.bf16.mxu0 %v2298_v33  ;;  %968 = vmatprep.subr.bf16.mxu1 %v2300_v34 }
 0x108   :  { %v325_v17 = vpop.f32.mrf.mxu0  ;;  %v368_v18 = vpop.f32.mrf.mxu1 }
 0x109   :  { %v326_v19 = vadd.f32 %v325_v17, %v108_v12  ;;  %v369_v20 = vadd.f32 %v368_v18, %v116_v13 }
 0x10a   :  { %v327_v21 = vpop.f32.mrf.mxu0  ;;  %v370_v22 = vpop.f32.mrf.mxu1 }
 0x10b   :  { %v328_v24 = vadd.f32 %v327_v21, %v112_v15  ;;  %v371_v25 = vadd.f32 %v370_v22, %v120_v16 }
 0x10c   :  { %v329_v26 = vpop.f32.mrf.mxu0  ;;  %v372_v27 = vpop.f32.mrf.mxu1 }
 0x10d   :  { %v381_v28 = vcombine.low %v326_v19, %v328_v24  ;;  %v404_v29 = vcombine.high %v326_v19, %v328_v24  ;;  %v382_v30 = vcombine.low %v369_v20, %v371_v25  ;;  %v405_v31 = vcombine.high %v369_v20, %v371_v25 }
 0x10e   :  { %v330_v32 = vadd.f32 %v329_v26, %v108_v12  ;;  %v373_v35 = vadd.f32 %v372_v27, %v116_v13  ;;  %v331_v3 = vpop.f32.mrf.mxu0  ;;  %v374_v5 = vpop.f32.mrf.mxu1 }
 0x10f   :  { %v2443_v6 = vrot.slane %v381_v28, %v2440_v23  ;;  %v2446_v7 = vrot.slane %v404_v29, %v2440_v23  ;;  %v2449_v4 = vrot.slane %v382_v30, %v2440_v23  ;;  %v2452_v8 = vrot.slane %v405_v31, %v2440_v23 }
 0x110   :  { %v332_v9 = vadd.f32 %v331_v3, %v112_v15  ;;  %v375_v10 = vadd.f32 %v374_v5, %v120_v16 }
 0x111   :  { %v400_v11 = vcombine.high %v2443_v6, %v2449_v4  ;;  %v420_v12 = vcombine.low %v2446_v7, %v2452_v8  ;;  %v424_v13 = vcombine.high %v2446_v7, %v2452_v8 }
 0x112   :  { %v432_v14 = vcombine.low %v330_v32, %v332_v9  ;;  %v456_v17 = vcombine.high %v330_v32, %v332_v9  ;;  %v433_v18 = vcombine.low %v373_v35, %v375_v10  ;;  %v457_v19 = vcombine.high %v373_v35, %v375_v10 }
 0x114   :  { %v2461_v20 = vrot.slane %v432_v14, %v2440_v23  ;;  %v2464_v21 = vrot.slane %v456_v17, %v2440_v23  ;;  %v2467_v15 = vrot.slane %v433_v18, %v2440_v23  ;;  %v2470_v16 = vrot.slane %v457_v19, %v2440_v23 }
 0x115   :  { %v397_v17 = vcombine.low %v2443_v6, %v2449_v4 }
 0x128   :  { %v707_v27 = vpop.f32.mrf.mxu0  ;;  %v748_v28 = vpop.f32.mrf.mxu1 }
 0x12a   :  { %v709_v29 = vpop.f32.mrf.mxu0  ;;  %v750_v30 = vpop.f32.mrf.mxu1 }
 0x12b   :  { %v759_v31 = vcombine.low %v707_v27, %v709_v29  ;;  %v760_v32 = vcombine.low %v748_v28, %v750_v30 }
 0x12c   :  { %v711_v35 = vpop.f32.mrf.mxu0  ;;  %v752_v3 = vpop.f32.mrf.mxu1 }
 0x12d   :  { %v767_v5 = vrot.slane %v759_v31, %v2440_v23  ;;  %v774_v9 = vrot.slane %v760_v32, %v2440_v23 }
 0x12e   :  { %v712_v10 = vpop.f32.mrf.mxu0  ;;  %v753_v14 = vpop.f32.mrf.mxu1 }
 0x12f   :  { %v775_v18 = vcombine.low %v767_v5, %v774_v9 }
 0x131   :  { %v777_v19 = vadd.f32 %v775_v18, %v397_v17 }
 0x133   :  { %v1884_v26 = vmul.f32 -1.442695, %v777_v19  ;;  %v785_v22 = vrot.slane %v777_v19, 6 }
 0x135   :  { %2054 = vpow2.f32 %v1884_v26 }
 0x142   :  { %v2055_v25 = vpop.eup %2054 }
 0x143   :  { %v781_v24 = vadd.f32 1.0, %v2055_v25 }
 0x145   :  { %2056 = vrcp.f32 %v781_v24 }
 0x146   :  { %2058 = vtanh.f32 %v785_v22 }
 0x152   :  { %v2057_v27 = vpop.eup %2056 }
 0x153   :  { %v789_v28 = vrot.slane %v2057_v27, 2  ;;  %v2059_v29 = vpop.eup %2058  ;;  %v795_v35 = vrot.slane %v2057_v27, 4 }
 0x154   :  { %v792_v30 = vmul.f32 %v2059_v29, %v2057_v27 }
 0x155   :  { %v791_v31 = vmul.f32 0.0, %v789_v28 }
 0x157   :  { %v2484_v32 = vadd.f32 %v792_v30, %v791_v31 }
 0x159   :  { %2060 = vtanh.f32 %v2484_v32 }
 0x166   :  { %v2061_v3 = vpop.eup %2060 }
 0x167   :  { %v797_v5 = vmul.f32 %v2061_v3, %v795_v35 }
 0x169   :  { %v799_v9 = vpack.c.bf16 %v797_v5, %v797_v5 }
 0x16b   :  { %833 = vmatmul.mubr.bf16.vlgmr.msra.gmra.mxu0 %v799_v9  ;;  %874 = vmatmul.mubr.bf16.vlgmr.msra.gmra.mxu1 %v799_v9 }
 0x16c   :  { %928 = vmatpush1.bf16.msra.mxu0 %v2305_v36  ;;  %969 = vmatpush1.bf16.msra.mxu1 %v2307_v37 }
 0x16d   :  { %929 = vmatprep.subr.bf16.mxu0 %v2309_v38  ;;  %970 = vmatprep.subr.bf16.mxu1 %v2313_v39 }
 0x16e   :  { %959 = vmatprep.mubr.bf16.mxu0 %v2237_v0  ;;  %1000 = vmatprep.mubr.bf16.mxu1 %v2237_v0 }
 0x170   :  { %930 = vmatpush1.bf16.msra.mxu0 %v2315_v40  ;;  %971 = vmatpush1.bf16.msra.mxu1 %v2319_v41 }
 0x171   :  { %931 = vmatprep.subr.bf16.mxu0 %v2323_v42  ;;  %972 = vmatprep.subr.bf16.mxu1 %v2325_v43 }
 0x174   :  { %932 = vmatpush1.bf16.msra.mxu0 %v2331_v44  ;;  %973 = vmatpush1.bf16.msra.mxu1 %v2333_v45 }
 0x175   :  { %933 = vmatprep.subr.bf16.mxu0 %v2335_v46  ;;  %974 = vmatprep.subr.bf16.mxu1 %v2339_v47 }
 0x178   :  { %934 = vmatpush1.bf16.msra.mxu0 %v2343_v48  ;;  %975 = vmatpush1.bf16.msra.mxu1 %v2345_v49 }
 0x179   :  { %935 = vmatprep.subr.bf16.mxu0 %v2349_v50  ;;  %976 = vmatprep.subr.bf16.mxu1 %v2351_v51 }
 0x17c   :  { %936 = vmatpush1.bf16.msra.mxu0 %v2355_v52  ;;  %977 = vmatpush1.bf16.msra.mxu1 %v2357_v53 }
 0x17d   :  { %937 = vmatprep.subr.bf16.mxu0 %v2361_v54  ;;  %978 = vmatprep.subr.bf16.mxu1 %v2363_v55 }
 0x180   :  { %938 = vmatpush1.bf16.msra.mxu0 %v2367_v56  ;;  %979 = vmatpush1.bf16.msra.mxu1 %v2369_v57 }
 0x181   :  { %939 = vmatprep.subr.bf16.mxu0 %v2373_v58  ;;  %980 = vmatprep.subr.bf16.mxu1 %v2375_v59 }
 0x184   :  { %940 = vmatpush1.bf16.msra.mxu0 %v2379_v60  ;;  %981 = vmatpush1.bf16.msra.mxu1 %v2381_v61 }
 0x185   :  { %941 = vmatprep.subr.bf16.mxu0 %v2385_v62  ;;  %982 = vmatprep.subr.bf16.mxu1 %v2387_v63 }
 0x188   :  { %942 = vmatpush1.bf16.msra.mxu0 %v2391_v1  ;;  %983 = vmatpush1.bf16.msra.mxu1 %v2393_v2 }
 0x189   :  { %1054 = vmatprep.subr.bf16.mxu0 %v2298_v33  ;;  %1095 = vmatprep.subr.bf16.mxu1 %v2300_v34 }
 0x22b   :  { %v834_v22 = vpop.f32.mrf.mxu0  ;;  %v875_v24 = vpop.f32.mrf.mxu1 }
 0x22d   :  { %v836_v25 = vpop.f32.mrf.mxu0  ;;  %v877_v26 = vpop.f32.mrf.mxu1 }
 0x22e   :  { %v886_v10 = vcombine.low %v834_v22, %v836_v25  ;;  %v887_v14 = vcombine.low %v875_v24, %v877_v26 }
 0x22f   :  { %v838_v17 = vpop.f32.mrf.mxu0  ;;  %v879_v18 = vpop.f32.mrf.mxu1 }
 0x230   :  { %v894_v19 = vrot.slane %v886_v10, %v2440_v23  ;;  %v901_v27 = vrot.slane %v887_v14, %v2440_v23 }
 0x231   :  { %v839_v28 = vpop.f32.mrf.mxu0  ;;  %v880_v29 = vpop.f32.mrf.mxu1 }
 0x232   :  { %v902_v30 = vcombine.low %v894_v19, %v901_v27 }
 0x234   :  { %v904_v31 = vadd.f32 %v902_v30, %v400_v11 }
 0x236   :  { %v1885_v35 = vmul.f32 -1.442695, %v904_v31  ;;  %v912_v9 = vrot.slane %v904_v31, 6 }
 0x238   :  { %2062 = vpow2.f32 %v1885_v35 }
 0x245   :  { %v2063_v3 = vpop.eup %2062 }
 0x246   :  { %v908_v5 = vadd.f32 1.0, %v2063_v3 }
 0x248   :  { %2064 = vrcp.f32 %v908_v5 }
 0x249   :  { %2066 = vtanh.f32 %v912_v9 }
 0x255   :  { %v2065_v22 = vpop.eup %2064 }
 0x256   :  { %v916_v24 = vrot.slane %v2065_v22, 2  ;;  %v2067_v25 = vpop.eup %2066  ;;  %v922_v17 = vrot.slane %v2065_v22, 4 }
 0x257   :  { %v919_v26 = vmul.f32 %v2067_v25, %v2065_v22 }
 0x258   :  { %v918_v10 = vmul.f32 %v916_v24, %v2484_v32 }
 0x25a   :  { %v2527_v14 = vadd.f32 %v919_v26, %v918_v10 }
 0x25c   :  { %2068 = vtanh.f32 %v2527_v14 }
 0x269   :  { %v2069_v6 = vpop.eup %2068 }
 0x26a   :  { %v924_v4 = vmul.f32 %v2069_v6, %v922_v17 }
 0x26c   :  { %v926_v11 = vpack.c.bf16 %v924_v4, %v924_v4 }
 0x26e   :  { %960 = vmatmul.mubr.bf16.vlgmr.msra.gmra.mxu0 %v926_v11  ;;  %1001 = vmatmul.mubr.bf16.vlgmr.msra.gmra.mxu1 %v926_v11 }
 0x26f   :  { %1055 = vmatpush1.bf16.msra.mxu0 %v2305_v36  ;;  %1096 = vmatpush1.bf16.msra.mxu1 %v2307_v37 }
 0x270   :  { %1056 = vmatprep.subr.bf16.mxu0 %v2309_v38  ;;  %1097 = vmatprep.subr.bf16.mxu1 %v2313_v39 }
 0x271   :  { %1086 = vmatprep.mubr.bf16.mxu0 %v2237_v0  ;;  %1127 = vmatprep.mubr.bf16.mxu1 %v2237_v0 }
 0x273   :  { %1057 = vmatpush1.bf16.msra.mxu0 %v2315_v40  ;;  %1098 = vmatpush1.bf16.msra.mxu1 %v2319_v41 }
 0x274   :  { %1058 = vmatprep.subr.bf16.mxu0 %v2323_v42  ;;  %1099 = vmatprep.subr.bf16.mxu1 %v2325_v43 }
 0x277   :  { %1059 = vmatpush1.bf16.msra.mxu0 %v2331_v44  ;;  %1100 = vmatpush1.bf16.msra.mxu1 %v2333_v45 }
 0x278   :  { %1060 = vmatprep.subr.bf16.mxu0 %v2335_v46  ;;  %1101 = vmatprep.subr.bf16.mxu1 %v2339_v47 }
 0x27b   :  { %1061 = vmatpush1.bf16.msra.mxu0 %v2343_v48  ;;  %1102 = vmatpush1.bf16.msra.mxu1 %v2345_v49 }
 0x27c   :  { %1062 = vmatprep.subr.bf16.mxu0 %v2349_v50  ;;  %1103 = vmatprep.subr.bf16.mxu1 %v2351_v51 }
 0x27f   :  { %1063 = vmatpush1.bf16.msra.mxu0 %v2355_v52  ;;  %1104 = vmatpush1.bf16.msra.mxu1 %v2357_v53 }
 0x280   :  { %1064 = vmatprep.subr.bf16.mxu0 %v2361_v54  ;;  %1105 = vmatprep.subr.bf16.mxu1 %v2363_v55 }
 0x283   :  { %1065 = vmatpush1.bf16.msra.mxu0 %v2367_v56  ;;  %1106 = vmatpush1.bf16.msra.mxu1 %v2369_v57 }
 0x284   :  { %1066 = vmatprep.subr.bf16.mxu0 %v2373_v58  ;;  %1107 = vmatprep.subr.bf16.mxu1 %v2375_v59 }
 0x287   :  { %1067 = vmatpush1.bf16.msra.mxu0 %v2379_v60  ;;  %1108 = vmatpush1.bf16.msra.mxu1 %v2381_v61 }
 0x288   :  { %1068 = vmatprep.subr.bf16.mxu0 %v2385_v62  ;;  %1109 = vmatprep.subr.bf16.mxu1 %v2387_v63 }
 0x28b   :  { %1069 = vmatpush1.bf16.msra.mxu0 %v2391_v1  ;;  %1110 = vmatpush1.bf16.msra.mxu1 %v2393_v2 }
 0x28c   :  { %1181 = vmatprep.subr.bf16.mxu0 %v2298_v33  ;;  %1222 = vmatprep.subr.bf16.mxu1 %v2300_v34 }
 0x32e   :  { %v961_v32 = vpop.f32.mrf.mxu0  ;;  %v1002_v18 = vpop.f32.mrf.mxu1 }
 0x330   :  { %v963_v19 = vpop.f32.mrf.mxu0  ;;  %v1004_v27 = vpop.f32.mrf.mxu1 }
 0x331   :  { %v1013_v28 = vcombine.low %v961_v32, %v963_v19  ;;  %v1014_v29 = vcombine.low %v1002_v18, %v1004_v27 }
 0x332   :  { %v965_v30 = vpop.f32.mrf.mxu0  ;;  %v1006_v31 = vpop.f32.mrf.mxu1 }
 0x333   :  { %v1021_v35 = vrot.slane %v1013_v28, %v2440_v23  ;;  %v1028_v3 = vrot.slane %v1014_v29, %v2440_v23 }
 0x334   :  { %v966_v5 = vpop.f32.mrf.mxu0  ;;  %v1007_v9 = vpop.f32.mrf.mxu1 }
 0x335   :  { %v1029_v22 = vcombine.low %v1021_v35, %v1028_v3 }
 0x337   :  { %v1031_v24 = vadd.f32 %v1029_v22, %v420_v12 }
 0x339   :  { %v1886_v25 = vmul.f32 -1.442695, %v1031_v24  ;;  %v1039_v17 = vrot.slane %v1031_v24, 6 }
 0x33b   :  { %2070 = vpow2.f32 %v1886_v25 }
 0x348   :  { %v2071_v26 = vpop.eup %2070 }
 0x349   :  { %v1035_v10 = vadd.f32 1.0, %v2071_v26 }
 0x34b   :  { %2072 = vrcp.f32 %v1035_v10 }
 0x34c   :  { %2074 = vtanh.f32 %v1039_v17 }
 0x358   :  { %v2073_v6 = vpop.eup %2072 }
 0x359   :  { %v1043_v4 = vrot.slane %v2073_v6, 2  ;;  %v2075_v11 = vpop.eup %2074  ;;  %v1049_v27 = vrot.slane %v2073_v6, 4 }
 0x35a   :  { %v1046_v32 = vmul.f32 %v2075_v11, %v2073_v6 }
 0x35b   :  { %v1045_v18 = vmul.f32 %v1043_v4, %v2527_v14 }
 0x35d   :  { %v2570_v19 = vadd.f32 %v1046_v32, %v1045_v18 }
 0x35f   :  { %2076 = vtanh.f32 %v2570_v19 }
 0x36c   :  { %v2077_v28 = vpop.eup %2076 }
 0x36d   :  { %v1051_v12 = vmul.f32 %v2077_v28, %v1049_v27 }
 0x36f   :  { %v1053_v29 = vpack.c.bf16 %v1051_v12, %v1051_v12 }
 0x371   :  { %1087 = vmatmul.mubr.bf16.vlgmr.msra.gmra.mxu0 %v1053_v29  ;;  %1128 = vmatmul.mubr.bf16.vlgmr.msra.gmra.mxu1 %v1053_v29 }
 0x372   :  { %1182 = vmatpush1.bf16.msra.mxu0 %v2305_v36  ;;  %1223 = vmatpush1.bf16.msra.mxu1 %v2307_v37 }
 0x373   :  { %1183 = vmatprep.subr.bf16.mxu0 %v2309_v38  ;;  %1224 = vmatprep.subr.bf16.mxu1 %v2313_v39 }
 0x374   :  { %1213 = vmatprep.mubr.bf16.mxu0 %v2237_v0  ;;  %1254 = vmatprep.mubr.bf16.mxu1 %v2237_v0 }
 0x376   :  { %1184 = vmatpush1.bf16.msra.mxu0 %v2315_v40  ;;  %1225 = vmatpush1.bf16.msra.mxu1 %v2319_v41 }
 0x377   :  { %1185 = vmatprep.subr.bf16.mxu0 %v2323_v42  ;;  %1226 = vmatprep.subr.bf16.mxu1 %v2325_v43 }
 0x37a   :  { %1186 = vmatpush1.bf16.msra.mxu0 %v2331_v44  ;;  %1227 = vmatpush1.bf16.msra.mxu1 %v2333_v45 }
 0x37b   :  { %1187 = vmatprep.subr.bf16.mxu0 %v2335_v46  ;;  %1228 = vmatprep.subr.bf16.mxu1 %v2339_v47 }
 0x37e   :  { %1188 = vmatpush1.bf16.msra.mxu0 %v2343_v48  ;;  %1229 = vmatpush1.bf16.msra.mxu1 %v2345_v49 }
 0x37f   :  { %1189 = vmatprep.subr.bf16.mxu0 %v2349_v50  ;;  %1230 = vmatprep.subr.bf16.mxu1 %v2351_v51 }
 0x382   :  { %1190 = vmatpush1.bf16.msra.mxu0 %v2355_v52  ;;  %1231 = vmatpush1.bf16.msra.mxu1 %v2357_v53 }
 0x383   :  { %1191 = vmatprep.subr.bf16.mxu0 %v2361_v54  ;;  %1232 = vmatprep.subr.bf16.mxu1 %v2363_v55 }
 0x386   :  { %1192 = vmatpush1.bf16.msra.mxu0 %v2367_v56  ;;  %1233 = vmatpush1.bf16.msra.mxu1 %v2369_v57 }
 0x387   :  { %1193 = vmatprep.subr.bf16.mxu0 %v2373_v58  ;;  %1234 = vmatprep.subr.bf16.mxu1 %v2375_v59 }
 0x38a   :  { %1194 = vmatpush1.bf16.msra.mxu0 %v2379_v60  ;;  %1235 = vmatpush1.bf16.msra.mxu1 %v2381_v61 }
 0x38b   :  { %1195 = vmatprep.subr.bf16.mxu0 %v2385_v62  ;;  %1236 = vmatprep.subr.bf16.mxu1 %v2387_v63 }
 0x38e   :  { %1196 = vmatpush1.bf16.msra.mxu0 %v2391_v1  ;;  %1237 = vmatpush1.bf16.msra.mxu1 %v2393_v2 }
 0x38f   :  { %1308 = vmatprep.subr.bf16.mxu0 %v2298_v33  ;;  %1349 = vmatprep.subr.bf16.mxu1 %v2300_v34 }
 0x431   :  { %v1088_v14 = vpop.f32.mrf.mxu0  ;;  %v1129_v30 = vpop.f32.mrf.mxu1 }
 0x433   :  { %v1090_v31 = vpop.f32.mrf.mxu0  ;;  %v1131_v35 = vpop.f32.mrf.mxu1 }
 0x434   :  { %v1140_v3 = vcombine.low %v1088_v14, %v1090_v31  ;;  %v1141_v5 = vcombine.low %v1129_v30, %v1131_v35 }
 0x435   :  { %v1092_v9 = vpop.f32.mrf.mxu0  ;;  %v1133_v22 = vpop.f32.mrf.mxu1 }
 0x436   :  { %v1148_v24 = vrot.slane %v1140_v3, %v2440_v23  ;;  %v1155_v25 = vrot.slane %v1141_v5, %v2440_v23 }
 0x437   :  { %v1093_v26 = vpop.f32.mrf.mxu0  ;;  %v1134_v10 = vpop.f32.mrf.mxu1 }
 0x438   :  { %v1156_v17 = vcombine.low %v1148_v24, %v1155_v25 }
 0x43a   :  { %v1158_v6 = vadd.f32 %v1156_v17, %v424_v13 }
 0x43c   :  { %v1887_v4 = vmul.f32 -1.442695, %v1158_v6  ;;  %v1166_v18 = vrot.slane %v1158_v6, 6 }
 0x43e   :  { %2078 = vpow2.f32 %v1887_v4 }
 0x44b   :  { %v2079_v11 = vpop.eup %2078 }
 0x44c   :  { %v1162_v32 = vadd.f32 1.0, %v2079_v11 }
 0x44e   :  { %2080 = vrcp.f32 %v1162_v32 }
 0x44f   :  { %2082 = vtanh.f32 %v1166_v18 }
 0x45b   :  { %v2081_v27 = vpop.eup %2080 }
 0x45c   :  { %v1170_v28 = vrot.slane %v2081_v27, 2  ;;  %v2083_v12 = vpop.eup %2082  ;;  %v1176_v31 = vrot.slane %v2081_v27, 4 }
 0x45d   :  { %v1173_v29 = vmul.f32 %v2083_v12, %v2081_v27 }
 0x45e   :  { %v1172_v14 = vmul.f32 %v1170_v28, %v2570_v19 }
 0x460   :  { %v2613_v30 = vadd.f32 %v1173_v29, %v1172_v14 }
 0x462   :  { %2084 = vtanh.f32 %v2613_v30 }
 0x46f   :  { %v2085_v7 = vpop.eup %2084 }
 0x470   :  { %v1178_v8 = vmul.f32 %v2085_v7, %v1176_v31 }
 0x472   :  { %v1180_v13 = vpack.c.bf16 %v1178_v8, %v1178_v8 }
 0x474   :  { %1214 = vmatmul.mubr.bf16.vlgmr.msra.gmra.mxu0 %v1180_v13  ;;  %1255 = vmatmul.mubr.bf16.vlgmr.msra.gmra.mxu1 %v1180_v13 }
 0x475   :  { %1309 = vmatpush1.bf16.msra.mxu0 %v2305_v36  ;;  %1350 = vmatpush1.bf16.msra.mxu1 %v2307_v37 }
 0x476   :  { %1310 = vmatprep.subr.bf16.mxu0 %v2309_v38  ;;  %1351 = vmatprep.subr.bf16.mxu1 %v2313_v39 }
 0x477   :  { %1340 = vmatprep.mubr.bf16.mxu0 %v2237_v0  ;;  %1381 = vmatprep.mubr.bf16.mxu1 %v2237_v0 }
 0x479   :  { %1311 = vmatpush1.bf16.msra.mxu0 %v2315_v40  ;;  %1352 = vmatpush1.bf16.msra.mxu1 %v2319_v41 }
 0x47a   :  { %1312 = vmatprep.subr.bf16.mxu0 %v2323_v42  ;;  %1353 = vmatprep.subr.bf16.mxu1 %v2325_v43 }
 0x47d   :  { %1313 = vmatpush1.bf16.msra.mxu0 %v2331_v44  ;;  %1354 = vmatpush1.bf16.msra.mxu1 %v2333_v45 }
 0x47e   :  { %1314 = vmatprep.subr.bf16.mxu0 %v2335_v46  ;;  %1355 = vmatprep.subr.bf16.mxu1 %v2339_v47 }
 0x481   :  { %1315 = vmatpush1.bf16.msra.mxu0 %v2343_v48  ;;  %1356 = vmatpush1.bf16.msra.mxu1 %v2345_v49 }
 0x482   :  { %1316 = vmatprep.subr.bf16.mxu0 %v2349_v50  ;;  %1357 = vmatprep.subr.bf16.mxu1 %v2351_v51 }
 0x485   :  { %1317 = vmatpush1.bf16.msra.mxu0 %v2355_v52  ;;  %1358 = vmatpush1.bf16.msra.mxu1 %v2357_v53 }
 0x486   :  { %1318 = vmatprep.subr.bf16.mxu0 %v2361_v54  ;;  %1359 = vmatprep.subr.bf16.mxu1 %v2363_v55 }
 0x489   :  { %1319 = vmatpush1.bf16.msra.mxu0 %v2367_v56  ;;  %1360 = vmatpush1.bf16.msra.mxu1 %v2369_v57 }
 0x48a   :  { %1320 = vmatprep.subr.bf16.mxu0 %v2373_v58  ;;  %1361 = vmatprep.subr.bf16.mxu1 %v2375_v59 }
 0x48d   :  { %1321 = vmatpush1.bf16.msra.mxu0 %v2379_v60  ;;  %1362 = vmatpush1.bf16.msra.mxu1 %v2381_v61 }
 0x48e   :  { %1322 = vmatprep.subr.bf16.mxu0 %v2385_v62  ;;  %1363 = vmatprep.subr.bf16.mxu1 %v2387_v63 }
 0x491   :  { %1323 = vmatpush1.bf16.msra.mxu0 %v2391_v1  ;;  %1364 = vmatpush1.bf16.msra.mxu1 %v2393_v2 }
 0x492   :  { %1435 = vmatprep.subr.bf16.mxu0 %v2298_v33  ;;  %1476 = vmatprep.subr.bf16.mxu1 %v2300_v34  ;;  %v2748_v33 = vcombine.low %v2461_v20, %v2467_v15 }
 0x534   :  { %v1215_v19 = vpop.f32.mrf.mxu0  ;;  %v1256_v35 = vpop.f32.mrf.mxu1 }
 0x536   :  { %v1217_v3 = vpop.f32.mrf.mxu0  ;;  %v1258_v5 = vpop.f32.mrf.mxu1 }
 0x537   :  { %v1267_v9 = vcombine.low %v1215_v19, %v1217_v3  ;;  %v1268_v22 = vcombine.low %v1256_v35, %v1258_v5 }
 0x538   :  { %v1219_v24 = vpop.f32.mrf.mxu0  ;;  %v1260_v25 = vpop.f32.mrf.mxu1 }
 0x539   :  { %v1275_v26 = vrot.slane %v1267_v9, %v2440_v23  ;;  %v1282_v10 = vrot.slane %v1268_v22, %v2440_v23 }
 0x53a   :  { %v1220_v17 = vpop.f32.mrf.mxu0  ;;  %v1261_v6 = vpop.f32.mrf.mxu1 }
 0x53b   :  { %v1283_v4 = vcombine.low %v1275_v26, %v1282_v10  ;;  %v2124_v17 = vld [vmem:[#allocation6 + $0xe0] ss:$16 sps:$4 sm:$0xff]   ;;  %v2125_v6 = vld [vmem:[#allocation6 + $0xe8] ss:$16 sps:$4 sm:$0xff]  }
 0x53d   :  { %v1285_v11 = vadd.f32 %v1283_v4, %v2748_v33  ;;  %v2126_v4 = vld [vmem:[#allocation6 + $0xc4] ss:$16 sps:$4 sm:$0xff]   ;;  %v2127_v33 = vld [vmem:[#allocation6 + $0xcc] ss:$16 sps:$4 sm:$0xff]  }
 0x53f   :  { %v1888_v34 = vmul.f32 -1.442695, %v1285_v11  ;;  %v1293_v27 = vrot.slane %v1285_v11, 6  ;;  %v2128_v11 = vld [vmem:[#allocation6 + $0xc0] ss:$16 sps:$4 sm:$0xff]  }
 0x541   :  { %2086 = vpow2.f32 %v1888_v34  ;;  %v2129_v34 = vld [vmem:[#allocation6 + $0xc8] ss:$16 sps:$4 sm:$0xff]  }
 0x54e   :  { %v2087_v32 = vpop.eup %2086 }
 0x54f   :  { %v1289_v18 = vadd.f32 1.0, %v2087_v32  ;;  %v2130_v32 = vld [vmem:[#allocation6 + $0xa4] ss:$16 sps:$4 sm:$0xff]  }
 0x551   :  { %2088 = vrcp.f32 %v1289_v18  ;;  %v2131_v18 = vld [vmem:[#allocation6 + $0xac] ss:$16 sps:$4 sm:$0xff]  }
 0x552   :  { %2090 = vtanh.f32 %v1293_v27  ;;  %v2132_v27 = vld [vmem:[#allocation6 + $0xa0] ss:$16 sps:$4 sm:$0xff]  }
 0x55e   :  { %v2089_v28 = vpop.eup %2088 }
 0x55f   :  { %v1297_v12 = vrot.slane %v2089_v28, 2  ;;  %v2091_v29 = vpop.eup %2090  ;;  %v1303_v8 = vrot.slane %v2089_v28, 4 }
 0x560   :  { %v1300_v14 = vmul.f32 %v2091_v29, %v2089_v28  ;;  %v2133_v28 = vld [vmem:[#allocation6 + $0xa8] ss:$16 sps:$4 sm:$0xff]   ;;  %v2135_v29 = vld [vmem:[#allocation6 + $0x8c] ss:$16 sps:$4 sm:$0xff]  }
 0x561   :  { %v1299_v31 = vmul.f32 %v1297_v12, %v2613_v30  ;;  %v2134_v12 = vld [vmem:[#allocation6 + $0x84] ss:$16 sps:$4 sm:$0xff]  }
 0x563   :  { %v2656_v7 = vadd.f32 %v1300_v14, %v1299_v31  ;;  %v2136_v14 = vld [vmem:[#allocation6 + $0x80] ss:$16 sps:$4 sm:$0xff]   ;;  %v2137_v31 = vld [vmem:[#allocation6 + $0x88] ss:$16 sps:$4 sm:$0xff]  }
 0x565   :  { %2092 = vtanh.f32 %v2656_v7 }
 0x572   :  { %v2093_v13 = vpop.eup %2092 }
 0x573   :  { %v1305_v19 = vmul.f32 %v2093_v13, %v1303_v8  ;;  %v2140_v8 = vld [vmem:[#allocation6 + $0x60] ss:$16 sps:$4 sm:$0xff]   ;;  %v2141_v13 = vld [vmem:[#allocation6 + $0x68] ss:$16 sps:$4 sm:$0xff]  }
 0x575   :  { %v1307_v35 = vpack.c.bf16 %v1305_v19, %v1305_v19  ;;  %v2142_v19 = vld [vmem:[#allocation6 + $0x44] ss:$16 sps:$4 sm:$0xff]  }
 0x577   :  { %1341 = vmatmul.mubr.bf16.vlgmr.msra.gmra.mxu0 %v1307_v35  ;;  %1382 = vmatmul.mubr.bf16.vlgmr.msra.gmra.mxu1 %v1307_v35  ;;  %v2143_v35 = vld [vmem:[#allocation6 + $0x4c] ss:$16 sps:$4 sm:$0xff]  }
 0x578   :  { %1436 = vmatpush1.bf16.msra.mxu0 %v2305_v36  ;;  %1477 = vmatpush1.bf16.msra.mxu1 %v2307_v37  ;;  %v2122_v36 = vld [vmem:[#allocation6 + $0xe4] ss:$16 sps:$4 sm:$0xff]   ;;  %v2123_v37 = vld [vmem:[#allocation6 + $0xec] ss:$16 sps:$4 sm:$0xff]  }
 0x579   :  { %1437 = vmatprep.subr.bf16.mxu0 %v2309_v38  ;;  %1478 = vmatprep.subr.bf16.mxu1 %v2313_v39 }
 0x57a   :  { %1467 = vmatprep.mubr.bf16.mxu0 %v2237_v0  ;;  %1508 = vmatprep.mubr.bf16.mxu1 %v2237_v0 }
 0x57c   :  { %1438 = vmatpush1.bf16.msra.mxu0 %v2315_v40  ;;  %1479 = vmatpush1.bf16.msra.mxu1 %v2319_v41 }
 0x57d   :  { %1439 = vmatprep.subr.bf16.mxu0 %v2323_v42  ;;  %1480 = vmatprep.subr.bf16.mxu1 %v2325_v43 }
 0x580   :  { %1440 = vmatpush1.bf16.msra.mxu0 %v2331_v44  ;;  %1481 = vmatpush1.bf16.msra.mxu1 %v2333_v45 }
 0x581   :  { %1441 = vmatprep.subr.bf16.mxu0 %v2335_v46  ;;  %1482 = vmatprep.subr.bf16.mxu1 %v2339_v47 }
 0x584   :  { %1442 = vmatpush1.bf16.msra.mxu0 %v2343_v48  ;;  %1483 = vmatpush1.bf16.msra.mxu1 %v2345_v49 }
 0x585   :  { %1443 = vmatprep.subr.bf16.mxu0 %v2349_v50  ;;  %1484 = vmatprep.subr.bf16.mxu1 %v2351_v51  ;;  %v2749_v51 = vcombine.high %v2461_v20, %v2467_v15 }
 0x588   :  { %1444 = vmatpush1.bf16.msra.mxu0 %v2355_v52  ;;  %1485 = vmatpush1.bf16.msra.mxu1 %v2357_v53 }
 0x589   :  { %1445 = vmatprep.subr.bf16.mxu0 %v2361_v54  ;;  %1486 = vmatprep.subr.bf16.mxu1 %v2363_v55 }
 0x58c   :  { %1446 = vmatpush1.bf16.msra.mxu0 %v2367_v56  ;;  %1487 = vmatpush1.bf16.msra.mxu1 %v2369_v57 }
 0x58d   :  { %1447 = vmatprep.subr.bf16.mxu0 %v2373_v58  ;;  %1488 = vmatprep.subr.bf16.mxu1 %v2375_v59 }
 0x590   :  { %1448 = vmatpush1.bf16.msra.mxu0 %v2379_v60  ;;  %1489 = vmatpush1.bf16.msra.mxu1 %v2381_v61 }
 0x591   :  { %1449 = vmatprep.subr.bf16.mxu0 %v2385_v62  ;;  %1490 = vmatprep.subr.bf16.mxu1 %v2387_v63 }
 0x594   :  { %1450 = vmatpush1.bf16.msra.mxu0 %v2391_v1  ;;  %1491 = vmatpush1.bf16.msra.mxu1 %v2393_v2 }
 0x595   :  { %1562 = vmatprep.subr.bf16.mxu0 %v2122_v36  ;;  %1603 = vmatprep.subr.bf16.mxu1 %v2123_v37 }
 0x637   :  { %v1342_v38 = vpop.f32.mrf.mxu0  ;;  %v1383_v39 = vpop.f32.mrf.mxu1 }
 0x639   :  { %v1344_v40 = vpop.f32.mrf.mxu0  ;;  %v1385_v41 = vpop.f32.mrf.mxu1 }
 0x63a   :  { %v1394_v42 = vcombine.low %v1342_v38, %v1344_v40  ;;  %v1395_v43 = vcombine.low %v1383_v39, %v1385_v41 }
 0x63b   :  { %v1346_v44 = vpop.f32.mrf.mxu0  ;;  %v1387_v45 = vpop.f32.mrf.mxu1 }
 0x63c   :  { %v1402_v46 = vrot.slane %v1394_v42, %v2440_v23  ;;  %v1409_v47 = vrot.slane %v1395_v43, %v2440_v23 }
 0x63d   :  { %v1347_v48 = vpop.f32.mrf.mxu0  ;;  %v1388_v49 = vpop.f32.mrf.mxu1 }
 0x63e   :  { %v1410_v50 = vcombine.low %v1402_v46, %v1409_v47 }
 0x640   :  { %v1412_v52 = vadd.f32 %v1410_v50, %v2749_v51 }
 0x642   :  { %v1889_v53 = vmul.f32 -1.442695, %v1412_v52  ;;  %v1420_v30 = vrot.slane %v1412_v52, 6 }
 0x644   :  { %2094 = vpow2.f32 %v1889_v53 }
 0x651   :  { %v2095_v54 = vpop.eup %2094 }
 0x652   :  { %v1416_v55 = vadd.f32 1.0, %v2095_v54 }
 0x654   :  { %2096 = vrcp.f32 %v1416_v55  ;;  %v2239_v55 = vmov 0.0  }
 0x655   :  { %2098 = vtanh.f32 %v1420_v30  ;;  %v1702_v30 = vld [vmem:[#allocation8 + $0x78] sm:$0xff] }
 0x661   :  { %v2097_v3 = vpop.eup %2096 }
 0x662   :  { %v1424_v5 = vrot.slane %v2097_v3, 2  ;;  %v2099_v9 = vpop.eup %2098  ;;  %v1430_v26 = vrot.slane %v2097_v3, 4 }
 0x663   :  { %v1427_v22 = vmul.f32 %v2099_v9, %v2097_v3  ;;  %v1701_v3 = vld [vmem:[#allocation8 + $0x70] sm:$0xff]  ;;  %v1699_v9 = vld [vmem:[#allocation8 + $0x60] sm:$0xff] }
 0x664   :  { %v1426_v24 = vmul.f32 %v1424_v5, %v2656_v7  ;;  %v2139_v7 = vld [vmem:[#allocation6 + $0x6c] ss:$16 sps:$4 sm:$0xff]  }
 0x665   :  { %v1700_v5 = vld [vmem:[#allocation8 + $0x68] sm:$0xff] }
 0x666   :  { %v2697_v25 = vadd.f32 %v1427_v22, %v1426_v24  ;;  %v1698_v22 = vld [vmem:[#allocation8 + $0x58] sm:$0xff]  ;;  %v1697_v24 = vld [vmem:[#allocation8 + $0x50] sm:$0xff] }
 0x668   :  { %2100 = vtanh.f32 %v2697_v25 }
 0x675   :  { %v2101_v20 = vpop.eup %2100 }
 0x676   :  { %v1432_v15 = vmul.f32 %v2101_v20, %v1430_v26  ;;  %v1695_v26 = vld [vmem:[#allocation8 + $0x40] sm:$0xff]  ;;  %v1694_v20 = vld [vmem:[#allocation8 + $0x38] sm:$0xff] }
 0x678   :  { %v1434_v10 = vpack.c.bf16 %v1432_v15, %v1432_v15  ;;  %v1693_v15 = vld [vmem:[#allocation8 + $0x30] sm:$0xff] }
 0x67a   :  { %1468 = vmatmul.mubr.bf16.vlgmr.msra.gmra.mxu0 %v1434_v10  ;;  %1509 = vmatmul.mubr.bf16.vlgmr.msra.gmra.mxu1 %v1434_v10  ;;  %v1692_v10 = vld [vmem:[#allocation8 + $0x28] sm:$0xff] }
 0x67b   :  { %1563 = vmatpush1.bf16.msra.mxu0 %v2124_v17  ;;  %1604 = vmatpush1.bf16.msra.mxu1 %v2125_v6  ;;  %v1691_v17 = vld [vmem:[#allocation8 + $0x20] sm:$0xff]  ;;  %v1690_v6 = vld [vmem:[#allocation8 + $0x18] sm:$0xff] }
 0x67c   :  { %1564 = vmatprep.subr.bf16.mxu0 %v2126_v4  ;;  %1605 = vmatprep.subr.bf16.mxu1 %v2127_v33  ;;  %v1689_v4 = vld [vmem:[#allocation8 + $0x10] sm:$0xff]  ;;  %v1688_v33 = vld [vmem:[#allocation8 + $0x8] sm:$0xff] }
 0x67d   :  { %1594 = vmatprep.mubr.bf16.mxu0 %v2237_v0  ;;  %1635 = vmatprep.mubr.bf16.mxu1 %v2237_v0  ;;  %v2138_v0 = vld [vmem:[#allocation6 + $0x64] ss:$16 sps:$4 sm:$0xff]  }
 0x67f   :  { %1565 = vmatpush1.bf16.msra.mxu0 %v2128_v11  ;;  %1606 = vmatpush1.bf16.msra.mxu1 %v2129_v34  ;;  %v1687_v11 = vld [vmem:[#allocation8] sm:$0xff] }
 0x680   :  { %1566 = vmatprep.subr.bf16.mxu0 %v2130_v32  ;;  %1607 = vmatprep.subr.bf16.mxu1 %v2131_v18 }
 0x683   :  { %1567 = vmatpush1.bf16.msra.mxu0 %v2132_v27  ;;  %1608 = vmatpush1.bf16.msra.mxu1 %v2133_v28 }
 0x684   :  { %1568 = vmatprep.subr.bf16.mxu0 %v2134_v12  ;;  %1609 = vmatprep.subr.bf16.mxu1 %v2135_v29 }
 0x687   :  { %1569 = vmatpush1.bf16.msra.mxu0 %v2136_v14  ;;  %1610 = vmatpush1.bf16.msra.mxu1 %v2137_v31 }
 0x688   :  { %1570 = vmatprep.subr.bf16.mxu0 %v2138_v0  ;;  %1611 = vmatprep.subr.bf16.mxu1 %v2139_v7 }
 0x68b   :  { %1571 = vmatpush1.bf16.msra.mxu0 %v2140_v8  ;;  %1612 = vmatpush1.bf16.msra.mxu1 %v2141_v13 }
 0x68c   :  { %1572 = vmatprep.subr.bf16.mxu0 %v2142_v19  ;;  %1613 = vmatprep.subr.bf16.mxu1 %v2143_v35  ;;  %v2751_v19 = vcombine.high %v2464_v21, %v2470_v16 }
 0x68f   :  { %1573 = vmatpush1.bf16.msra.mxu0 %v2367_v56  ;;  %1614 = vmatpush1.bf16.msra.mxu1 %v2369_v57 }
 0x690   :  { %1574 = vmatprep.subr.bf16.mxu0 %v2373_v58  ;;  %1615 = vmatprep.subr.bf16.mxu1 %v2375_v59 }
 0x693   :  { %1575 = vmatpush1.bf16.msra.mxu0 %v2379_v60  ;;  %1616 = vmatpush1.bf16.msra.mxu1 %v2381_v61 }
 0x694   :  { %1576 = vmatprep.subr.bf16.mxu0 %v2385_v62  ;;  %1617 = vmatprep.subr.bf16.mxu1 %v2387_v63  ;;  %v2750_v63 = vcombine.low %v2464_v21, %v2470_v16 }
 0x697   :  { %1577 = vmatpush1.bf16.msra.mxu0 %v2391_v1  ;;  %1618 = vmatpush1.bf16.msra.mxu1 %v2393_v2 }
 0x698   :  { %1910 = vmatprep.subr.mxu0 %v2239_v55 }
 0x73a   :  { %v1469_v36 = vpop.f32.mrf.mxu0  ;;  %v1510_v56 = vpop.f32.mrf.mxu1 }
 0x73c   :  { %v1471_v37 = vpop.f32.mrf.mxu0  ;;  %v1512_v57 = vpop.f32.mrf.mxu1 }
 0x73d   :  { %v1521_v38 = vcombine.low %v1469_v36, %v1471_v37  ;;  %v1522_v58 = vcombine.low %v1510_v56, %v1512_v57 }
 0x73e   :  { %v1473_v39 = vpop.f32.mrf.mxu0  ;;  %v1514_v59 = vpop.f32.mrf.mxu1 }
 0x73f   :  { %v1529_v60 = vrot.slane %v1521_v38, %v2440_v23  ;;  %v1536_v61 = vrot.slane %v1522_v58, %v2440_v23 }
 0x740   :  { %v1474_v40 = vpop.f32.mrf.mxu0  ;;  %v1515_v62 = vpop.f32.mrf.mxu1 }
 0x741   :  { %v1537_v41 = vcombine.low %v1529_v60, %v1536_v61  ;;  %v1892_v40 = vld [vmem:[%s2744_s5] ss:$0 sm:$0xff] }
 0x743   :  { %v1539_v1 = vadd.f32 %v1537_v41, %v2750_v63 }
 0x745   :  { %v1890_v2 = vmul.f32 -1.442695, %v1539_v1  ;;  %v1547_v44 = vrot.slane %v1539_v1, 6 }
 0x747   :  { %2102 = vpow2.f32 %v1890_v2 }
 0x754   :  { %v2103_v42 = vpop.eup %2102 }
 0x755   :  { %v1543_v43 = vadd.f32 1.0, %v2103_v42 }
 0x757   :  { %2104 = vrcp.f32 %v1543_v43 }
 0x758   :  { %2106 = vtanh.f32 %v1547_v44 }
 0x764   :  { %v2105_v45 = vpop.eup %2104 }
 0x765   :  { %v1551_v46 = vrot.slane %v2105_v45, 2  ;;  %v2107_v47 = vpop.eup %2106  ;;  %v1557_v51 = vrot.slane %v2105_v45, 4 }
 0x766   :  { %v1554_v48 = vmul.f32 %v2107_v47, %v2105_v45 }
 0x767   :  { %v1553_v49 = vmul.f32 %v1551_v46, %v2697_v25  ;;  %v1696_v25 = vld [vmem:[#allocation8 + $0x48] sm:$0xff] }
 0x769   :  { %v2718_v50 = vadd.f32 %v1554_v48, %v1553_v49 }
 0x76b   :  { %2108 = vtanh.f32 %v2718_v50 }
 0x778   :  { %v2109_v52 = vpop.eup %2108 }
 0x779   :  { %v1559_v53 = vmul.f32 %v2109_v52, %v1557_v51 }
 0x77b   :  { %v1561_v54 = vpack.c.bf16 %v1559_v53, %v1559_v53 }
 0x77d   :  { %1595 = vmatmul.mubr.bf16.vlgmr.msra.gmra.mxu0 %v1561_v54  ;;  %1636 = vmatmul.mubr.bf16.vlgmr.msra.gmra.mxu1 %v1561_v54 }
 0x77e   :  { %1911 = vmatpush3.msra.mxu0 %v1702_v30  ;;  %1942 = vmatprep.mubr.msk.f32.mxu0 %vm2240_vm0, %v2239_v55 }
 0x77f   :  { %1912 = vmatprep.subr.mxu0 %v2239_v55 }
 0x780   :  { %1913 = vmatpush3.msra.mxu0 %v1701_v3 }
 0x781   :  { %1914 = vmatprep.subr.mxu0 %v2239_v55 }
 0x782   :  { %1915 = vmatpush3.msra.mxu0 %v1700_v5 }
 0x783   :  { %1916 = vmatprep.subr.mxu0 %v2239_v55 }
 0x784   :  { %1917 = vmatpush3.msra.mxu0 %v1699_v9 }
 0x785   :  { %1918 = vmatprep.subr.mxu0 %v2239_v55 }
 0x786   :  { %1919 = vmatpush3.msra.mxu0 %v1698_v22 }
 0x787   :  { %1920 = vmatprep.subr.mxu0 %v2239_v55 }
 0x788   :  { %1921 = vmatpush3.msra.mxu0 %v1697_v24 }
 0x789   :  { %1922 = vmatprep.subr.mxu0 %v2239_v55 }
 0x78a   :  { %1923 = vmatpush3.msra.mxu0 %v1696_v25 }
 0x78b   :  { %1924 = vmatprep.subr.mxu0 %v2239_v55 }
 0x78c   :  { %1925 = vmatpush3.msra.mxu0 %v1695_v26 }
 0x78d   :  { %1926 = vmatprep.subr.mxu0 %v2239_v55 }
 0x78e   :  { %1927 = vmatpush3.msra.mxu0 %v1694_v20 }
 0x78f   :  { %1928 = vmatprep.subr.mxu0 %v2239_v55 }
 0x790   :  { %1929 = vmatpush3.msra.mxu0 %v1693_v15 }
 0x791   :  { %1930 = vmatprep.subr.mxu0 %v2239_v55 }
 0x792   :  { %1931 = vmatpush3.msra.mxu0 %v1692_v10 }
 0x793   :  { %1932 = vmatprep.subr.mxu0 %v2239_v55 }
 0x794   :  { %1933 = vmatpush3.msra.mxu0 %v1691_v17 }
 0x795   :  { %1934 = vmatprep.subr.mxu0 %v2239_v55 }
 0x796   :  { %1935 = vmatpush3.msra.mxu0 %v1690_v6 }
 0x797   :  { %1936 = vmatprep.subr.mxu0 %v2239_v55 }
 0x798   :  { %1937 = vmatpush3.msra.mxu0 %v1689_v4 }
 0x799   :  { %1938 = vmatprep.subr.mxu0 %v2239_v55 }
 0x79a   :  { %1939 = vmatpush3.msra.mxu0 %v1688_v33 }
 0x79b   :  { %1940 = vmatprep.subr.mxu0 %v2239_v55 }
 0x79c   :  { %1941 = vmatpush3.msra.mxu0 %v1687_v11 }
 0x83d   :  { %v1596_v34 = vpop.f32.mrf.mxu0  ;;  %v1637_v32 = vpop.f32.mrf.mxu1 }
 0x83f   :  { %v1598_v18 = vpop.f32.mrf.mxu0  ;;  %v1639_v27 = vpop.f32.mrf.mxu1 }
 0x840   :  { %v1648_v28 = vcombine.low %v1596_v34, %v1598_v18  ;;  %v1649_v12 = vcombine.low %v1637_v32, %v1639_v27 }
 0x841   :  { %v1600_v29 = vpop.f32.mrf.mxu0  ;;  %v1641_v14 = vpop.f32.mrf.mxu1 }
 0x842   :  { %v1656_v31 = vrot.slane %v1648_v28, %v2440_v23  ;;  %v1663_v0 = vrot.slane %v1649_v12, %v2440_v23 }
 0x843   :  { %v1601_v7 = vpop.f32.mrf.mxu0  ;;  %v1642_v8 = vpop.f32.mrf.mxu1 }
 0x844   :  { %v1664_v13 = vcombine.low %v1656_v31, %v1663_v0 }
 0x846   :  { %v1666_v35 = vadd.f32 %v1664_v13, %v2751_v19 }
 0x848   :  { %v1891_v36 = vmul.f32 -1.442695, %v1666_v35  ;;  %v1674_v57 = vrot.slane %v1666_v35, 6 }
 0x84a   :  { %2110 = vpow2.f32 %v1891_v36 }
 0x857   :  { %v2111_v56 = vpop.eup %2110 }
 0x858   :  { %v1670_v37 = vadd.f32 1.0, %v2111_v56 }
 0x85a   :  { %2112 = vrcp.f32 %v1670_v37 }
 0x85b   :  { %2114 = vtanh.f32 %v1674_v57 }
 0x867   :  { %v2113_v38 = vpop.eup %2112 }
 0x868   :  { %v1678_v58 = vrot.slane %v2113_v38, 2  ;;  %v2115_v39 = vpop.eup %2114  ;;  %v1684_v21 = vrot.slane %v2113_v38, 4 }
 0x869   :  { %v1681_v59 = vmul.f32 %v2115_v39, %v2113_v38 }
 0x86a   :  { %v1680_v23 = vmul.f32 %v1678_v58, %v2718_v50 }
 0x86c   :  { %v1682_v60 = vadd.f32 %v1681_v59, %v1680_v23 }
 0x86e   :  { %2116 = vtanh.f32 %v1682_v60  ;;  %1794 = vst [vmem:[%s2747_s8] sm:$0x3] %v1682_v60 }
 0x87b   :  { %v2117_v16 = vpop.eup %2116 }
 0x87c   :  { %v1686_v61 = vmul.f32 %v2117_v16, %v1684_v21 }
 0x87e   :  { %1943 = vmatmul.mubr.f32.vlgmr.msra.gmra.mxu0 %v1686_v61  ;;  %1793 = vst [vmem:[%s2746_s7] sm:$0x3] %v1686_v61  ;;  %s2241_s7 = smov [#allocation9]  }
 0x87f   :  { %s1801_s8 = sshll.u32 %s2241_s7, 4  ;;  %s1802_s8 = int_to_ptr.vmem [resolvable:$true] %s1801_s8 }
 0x880   :  { %s2204_s5 = scalar_lea.vmem %s1802_s8, 32  ;;  %p2209_p2 = scmp.lt.s32.totalorder %s1802_s8, %s1802_s8 }
 0x881   :  { %p2205_p1 = scmp.ne.s32.totalorder %s1802_s8, %s2204_s5  ;;  %p2210_p3 = scmp.lt.s32.totalorder %s2204_s5, %s2204_s5 }
 0x883   :  { %p2211_p4 = por %p2210_p3, %p2209_p2 }
 0x885   :  { %p2212_p5 = pnand %p2211_p4, %p2205_p1 }
 0x93e   :  { %v1776_v62 = vpop.f32.mrf.mxu0 }
 0x93f   :  { %v1777_v41 = vadd.f32 %v1892_v40, %v1776_v62 }
 0x940   :  { %v1944_v63 = vpop.f32.mrf.mxu0 }
 0x941   :  { %v1781_v1 = vsel %vm1780_vm1, %v1777_v41, -inf }
 0x942   :  { %1782 = vmax.xlane.f32.xlu0 %v1781_v1 }
 0x9cb   :  { %v1783_v2 = vpop.xlane.xlu0 %1782 }
 0x9cc   :  { %v1784_v42 = vsub.f32 %v1777_v41, %v1783_v2 }
 0x9ce   :  { %v1785_v43 = vmul.f32 1.442695, %v1784_v42 }
 0x9d0   :  { %2118 = vpow2.f32 %v1785_v43 }
 0x9dd   :  { %v2119_v44 = vpop.eup %2118 }
 0x9de   :  { %v1787_v45 = vsel %vm1780_vm1, %v2119_v44, 0.0 }
 0x9df   :  { %1788 = vadd.xlane.f32.xlu0 %v1787_v45 }
 0xa68   :  { %v1789_v46 = vpop.xlane.xlu0 %1788 }
 0xa69   :  { %2120 = vrcp.f32 %v1789_v46 }
 0xa76   :  { %v2121_v47 = vpop.eup %2120 }
 0xa77   :  { %v1791_v48 = vmul.f32 %v2121_v47, %v2119_v44 }
 0xa79   :  { %1792 = vst [vmem:[#allocation9] sm:$0x3] %v1791_v48 }
 0xa7a   :  { %2215 = shalt.err (!%p2212_p5)
}
 0xa7b   :  { %1804 = dma.vmem_to_hbm [thread:$0]  %s1802_s8, 32, %s2745_s6, [#allocation5]  }
 0xa7c   :  { %2228 = dma.done.wait [#allocation5], 32  }
 0xa7d   :  { %2229 = vsyncadd [#allocation5], 4294967264 }
 0xa7e   :  { %1816 = vsyncpa [#allocation4], 1 }
 0xa7f   :  { %1817 = vsyncpa [#allocation7], 1 }
 0xa80   :  { %1818 = vsyncpa [#allocation5], 1 }

</bundles_post_ra>
